<compile_context>
chip_gen: v7x
topology: tpu7x:2x2x1
jax: 0.10.0
libtpu: 0.0.40
codegen_flags: <defaults>
</compile_context>

<pallas_src>
import functools

import jax
import jax.numpy as jnp
from jax.experimental import pallas as pl
from jax.experimental.pallas import tpu as pltpu


# ----------------------------------------------------------------------------
# Pallas kernel: 3x3 / stride-2 / pad-1 conv for `bsz` images of one grid step.
#
#   e0,e1,e2 : even padded rows, column tap kx=0/1/2, block (bsz, (Ho+1)*Wo, Cin)
#   o0,o1,o2 : odd  padded rows, column tap kx=0/1/2, block (bsz,  Ho   *Wo, Cin)
#   w_ref    : fuse_k: (9*Cin, Cout)  [row = (ky*3+kx)*Cin + c]
#              else  : (9, Cin, Cout) [leading index = ky*3+kx]
#   b_ref    : (1, Cout) float32
#   o_ref    : (bsz, Ho*Wo, Cout)
#   scratch  : fuse_k: (bsz*Mp, 9*Cin) compute-dtype im2col staging
#              else  : (bsz*Mp, Cout)  float32 accumulator      (Mp = M rounded to 8)
#
# Tap (ky, kx) for output pixel p (= ho*Wo + wo):
#   ky=0 -> even plane row p        (padded input row 2*ho)
#   ky=1 -> odd  plane row p        (padded input row 2*ho + 1)
#   ky=2 -> even plane row p + Wo   (padded input row 2*ho + 2)
# ----------------------------------------------------------------------------
def _conv3x3_s2_kernel(fuse_k, relu_input, bsz, wo,
                       e0, e1, e2, o0, o1, o2, w_ref, b_ref, o_ref,
                       scratch_ref):
    m = o_ref.shape[1]                         # Ho*Wo output pixels per image
    cin = e0.shape[-1]
    m_pad = scratch_ref.shape[0] // bsz        # sublane-aligned per-image stride
    e_refs = (e0, e1, e2)
    o_refs = (o0, o1, o2)

    for b in range(bsz):
        # Load each of the 6 plane blocks exactly once; fused ReLU applied per
        # plane (not per tap) -- both row windows of an even plane share the load.
        e_vals, o_vals = [], []
        for kx in range(3):
            ev = e_refs[kx][b]                 # ((Ho+1)*Wo, Cin)
            ov = o_refs[kx][b]                 # ( Ho   *Wo, Cin)
            if relu_input:                     # fused ReLU on the conv input (p7)
                ev = jnp.maximum(ev, 0.0)
                ov = jnp.maximum(ov, 0.0)
            e_vals.append(ev)
            o_vals.append(ov)

        def tap(ky, kx):
            if ky == 0:
                return e_vals[kx][0:m]
            if ky == 1:
                return o_vals[kx]
            return e_vals[kx][wo:wo + m]

        row0 = b * m_pad
        if fuse_k:
            # Stage the (m, 9*Cin) im2col tile: every store is Cin wide at a
            # 128-aligned lane offset (Cin % 128 == 0 on this path).
            for ky in range(3):
                for kx in range(3):
                    t = ky * 3 + kx
                    scratch_ref[pl.ds(row0, m), pl.ds(t * cin, cin)] = tap(ky, kx)
        else:
            # Small / unaligned Cin: 9 tap dots accumulated in-place into the
            # f32 VMEM scratch (v7x MRB-friendly, no spilled register chain).
            for ky in range(3):
                for kx in range(3):
                    t = ky * 3 + kx
                    part = jnp.dot(tap(ky, kx), w_ref[t],
                                   preferred_element_type=jnp.float32)
                    if t == 0:
                        scratch_ref[pl.ds(row0, m), :] = part
                    else:
                        scratch_ref[pl.ds(row0, m), :] += part

    if fuse_k:
        # One MXU pass with K = 9*Cin: internal accumulation, no 8-deep f32
        # add/store chain over the (M, Cout) accumulator.
        acc = jnp.dot(scratch_ref[...], w_ref[...],
                      preferred_element_type=jnp.float32)
        acc = acc + b_ref[...]
        for b in range(bsz):
            o_ref[b] = acc[b * m_pad:b * m_pad + m, :].astype(o_ref.dtype)
    else:
        for b in range(bsz):
            out = scratch_ref[pl.ds(b * m_pad, m), :] + b_ref[...]
            o_ref[b] = out.astype(o_ref.dtype)


def _pick_images_per_step(n, per_image_bytes, fixed_bytes, budget_bytes):
    """Largest divisor B of n keeping >=2 grid steps (when n>=2) and within VMEM."""
    best = 1
    min_steps = min(2, n)
    for cand in range(1, n + 1):
        if n % cand:
            continue
        if n // cand < min_steps:
            continue
        if fixed_bytes + cand * per_image_bytes > budget_bytes:
            continue
        best = max(best, cand)
    return best


# ----------------------------------------------------------------------------
# One conv layer: 3x3, stride 2, pad 1 (NHWC), optionally ReLU'ing its input.
# ----------------------------------------------------------------------------
def conv3x3_s2_nhwc(x, w_hwio, b, *, relu_input=False,
                    compute_dtype=jnp.bfloat16, out_dtype=None,
                    vmem_budget_bytes=10 << 20):
    """x: (N,H,W,Cin), w_hwio: (3,3,Cin,Cout), b: (Cout,). Returns (N,Ho,Wo,Cout)."""
    n, h, w, cin = x.shape
    cout = w_hwio.shape[-1]
    ho = (h - 1) // 2 + 1
    wo = (w - 1) // 2 + 1
    m = ho * wo
    m_pad = ((m + 7) // 8) * 8                 # sublane-aligned per-image stride
    if out_dtype is None:
        out_dtype = x.dtype

    # Pad once; six parity planes (strided slices XLA fuses with the pad),
    # already flattened over output pixels so the kernel never reshapes.
    xp = jnp.pad(x.astype(compute_dtype), ((0, 0), (1, 1), (1, 1), (0, 0)))
    e_planes = [xp[:, 0:2 * ho + 1:2, kx:kx + 2 * wo - 1:2, :]
                .reshape(n, (ho + 1) * wo, cin) for kx in range(3)]
    o_planes = [xp[:, 1:2 * ho:2, kx:kx + 2 * wo - 1:2, :]
                .reshape(n, ho * wo, cin) for kx in range(3)]

    # Lane-aligned channels -> single K=9*Cin dot via an im2col VMEM scratch.
    fuse_k = (cin % 128 == 0)
    if fuse_k:
        w_kernel = w_hwio.reshape(9 * cin, cout).astype(compute_dtype)
        w_spec = pl.BlockSpec((9 * cin, cout), lambda i: (0, 0))
    else:
        w_kernel = w_hwio.reshape(9, cin, cout).astype(compute_dtype)
        w_spec = pl.BlockSpec((9, cin, cout), lambda i: (0, 0, 0))
    b2 = b.reshape(1, cout).astype(jnp.float32)

    # Images per grid step: amortize the ~0.35us per-step overhead while keeping
    # >=2 steps (both v7x TensorCores busy) and the double-buffered working set
    # inside a conservative budget sized for v7x's 64 MiB VMEM.
    comp_isz = jnp.dtype(compute_dtype).itemsize
    out_isz = jnp.dtype(out_dtype).itemsize
    plane_rows = 3 * ((ho + 1) * wo) + 3 * (ho * wo)
    per_img = 2 * plane_rows * cin * comp_isz                 # double-buffered planes
    per_img += 2 * m * cout * out_isz                         # double-buffered output
    per_img += m_pad * 9 * cin * comp_isz if fuse_k else m_pad * cout * 4
    fixed = 2 * (9 * cin * cout * comp_isz + cout * 4)        # weights + bias
    bsz = _pick_images_per_step(n, per_img, fixed, vmem_budget_bytes)

    if fuse_k:
        scratch = pltpu.VMEM((bsz * m_pad, 9 * cin), compute_dtype)
    else:
        scratch = pltpu.VMEM((bsz * m_pad, cout), jnp.float32)

    e_spec = pl.BlockSpec((bsz, (ho + 1) * wo, cin), lambda i: (i, 0, 0))
    o_spec = pl.BlockSpec((bsz, ho * wo, cin), lambda i: (i, 0, 0))

    out = pl.pallas_call(
        functools.partial(_conv3x3_s2_kernel, fuse_k, relu_input, bsz, wo),
        out_shape=jax.ShapeDtypeStruct((n, m, cout), out_dtype),
        grid_spec=pltpu.PrefetchScalarGridSpec(
            num_scalar_prefetch=0,
            grid=(n // bsz,),                                  # image groups
            in_specs=[e_spec, e_spec, e_spec,
                      o_spec, o_spec, o_spec,
                      w_spec,                                   # grid-invariant
                      pl.BlockSpec((1, cout), lambda i: (0, 0))],
            out_specs=pl.BlockSpec((bsz, m, cout), lambda i: (i, 0, 0)),
            scratch_shapes=[scratch],
        ),
        compiler_params=pltpu.CompilerParams(
            dimension_semantics=("parallel",),                  # megacore over groups
            vmem_limit_bytes=32 * 1024 * 1024),
    )(*e_planes, *o_planes, w_kernel, b2)

    return out.reshape(n, ho, wo, cout)


# ----------------------------------------------------------------------------
# Module: LastLevelP6P7
# ----------------------------------------------------------------------------
def init_last_level_p6p7(key, in_channels, out_channels, dtype=jnp.float32):
    """c2_xavier_fill ~ kaiming_uniform(a=1): U(-sqrt(3/fan_in), +), bias = 0."""
    k6, k7 = jax.random.split(key)
    bound6 = (3.0 / (in_channels * 9)) ** 0.5
    bound7 = (3.0 / (out_channels * 9)) ** 0.5
    return {
        "w6": jax.random.uniform(k6, (3, 3, in_channels, out_channels),
                                 dtype, -bound6, bound6),
        "b6": jnp.zeros((out_channels,), dtype),
        "w7": jax.random.uniform(k7, (3, 3, out_channels, out_channels),
                                 dtype, -bound7, bound7),
        "b7": jnp.zeros((out_channels,), dtype),
    }


def last_level_p6p7_nhwc(p5_nhwc, params, *, compute_dtype=jnp.bfloat16):
    """NHWC end-to-end core (no layout round trips between p6 and p7)."""
    p6 = conv3x3_s2_nhwc(p5_nhwc, params["w6"], params["b6"],
                         relu_input=False, compute_dtype=compute_dtype)
    p7 = conv3x3_s2_nhwc(p6, params["w7"], params["b7"],
                         relu_input=True, compute_dtype=compute_dtype)
    return [p6, p7]


def last_level_p6p7(p5_nchw, params, *, compute_dtype=jnp.bfloat16):
    """Public PyTorch-compatible NCHW wrapper (transposes only at the boundary)."""
    x = jnp.transpose(p5_nchw, (0, 2, 3, 1))
    p6, p7 = last_level_p6p7_nhwc(x, params, compute_dtype=compute_dtype)
    return [jnp.transpose(p6, (0, 3, 1, 2)), jnp.transpose(p7, (0, 3, 1, 2))]


# ----------------------------------------------------------------------------
# Pure-JAX reference (lax conv) for correctness checking
# ----------------------------------------------------------------------------
def _ref_conv(x_nchw, w_hwio, b):
    w_oihw = jnp.transpose(w_hwio, (3, 2, 0, 1))
    y = jax.lax.conv_general_dilated(
        x_nchw, w_oihw, window_strides=(2, 2), padding=((1, 1), (1, 1)),
        dimension_numbers=("NCHW", "OIHW", "NCHW"))
    return y + b.reshape(1, -1, 1, 1)


def _ref_last_level_p6p7(p5, params):
    p6 = _ref_conv(p5, params["w6"], params["b6"])
    p7 = _ref_conv(jnp.maximum(p6, 0.0), params["w7"], params["b7"])
    return [p6, p7]


if __name__ == "__main__":
    key = jax.random.PRNGKey(0)
    k_x, k_p, k_x2, k_p2 = jax.random.split(key, 4)

    # ---- small-channel config (toy shapes): 9-dot scratch-accumulate path ----
    in_channels, out_channels = 4, 4
    p5 = jax.random.normal(k_x, (2, in_channels, 16, 16), jnp.float32)   # NCHW
    params = init_last_level_p6p7(k_p, in_channels, out_channels)
    r6, r7 = _ref_last_level_p6p7(p5, params)

    # 1) f32 MXU feed: tight correctness check against the lax reference.
    fwd_f32 = jax.jit(lambda x, p: last_level_p6p7(x, p,
                                                   compute_dtype=jnp.float32))
    p6, p7 = fwd_f32(p5, params)
    jax.block_until_ready(p6)
    jax.block_until_ready(p7)
    assert p6.shape == (2, out_channels, 8, 8), p6.shape
    assert p7.shape == (2, out_channels, 4, 4), p7.shape
    assert jnp.allclose(p6, r6, atol=1e-4, rtol=1e-4)
    assert jnp.allclose(p7, r7, atol=1e-4, rtol=1e-4)

    # 2) Production path: bf16 feed to the MXU, f32 accumulation (default).
    fwd_bf16 = jax.jit(lambda x, p: last_level_p6p7(x, p))
    p6b, p7b = fwd_bf16(p5, params)
    jax.block_until_ready(p6b)
    jax.block_until_ready(p7b)
    assert jnp.allclose(p6b, r6, atol=1e-1, rtol=1e-1)
    assert jnp.allclose(p7b, r7, atol=1e-1, rtol=1e-1)

    # ---- lane-aligned channels (FCOS-like): fused single K=9*Cin dot path ----
    in_channels2, out_channels2 = 128, 128
    p5b = jax.random.normal(k_x2, (2, in_channels2, 16, 16), jnp.float32)
    params2 = init_last_level_p6p7(k_p2, in_channels2, out_channels2)
    r6b, r7b = _ref_last_level_p6p7(p5b, params2)

    fwd_f32_big = jax.jit(lambda x, p: last_level_p6p7(x, p,
                                                       compute_dtype=jnp.float32))
    q6, q7 = fwd_f32_big(p5b, params2)
    jax.block_until_ready(q6)
    jax.block_until_ready(q7)
    assert q6.shape == (2, out_channels2, 8, 8), q6.shape
    assert q7.shape == (2, out_channels2, 4, 4), q7.shape
    assert jnp.allclose(q6, r6b, atol=3e-2, rtol=3e-2)
    assert jnp.allclose(q7, r7b, atol=3e-2, rtol=3e-2)

    print("KERNEL_OK")
</pallas_src>

<mosaic_0001>
module attributes {stable_mosaic.version = 11 : i64} {
  func.func @_conv3x3_s2_kernel(%arg0: i32, %arg1: memref<1x72x4xf32, #tpu.memory_space<vmem>>, %arg2: memref<1x72x4xf32, #tpu.memory_space<vmem>>, %arg3: memref<1x72x4xf32, #tpu.memory_space<vmem>>, %arg4: memref<1x64x4xf32, #tpu.memory_space<vmem>>, %arg5: memref<1x64x4xf32, #tpu.memory_space<vmem>>, %arg6: memref<1x64x4xf32, #tpu.memory_space<vmem>>, %arg7: memref<9x4x4xf32, #tpu.memory_space<vmem>>, %arg8: memref<1x4xf32, #tpu.memory_space<vmem>>, %arg9: memref<1x64x4xf32, #tpu.memory_space<vmem>>, %arg10: memref<64x4xf32, #tpu.memory_space<vmem>>) attributes {dimension_semantics = [#tpu.dimension_semantics<parallel>], iteration_bounds = array<i64: 2>, scalar_prefetch = 0 : i64, scratch_operands = 1 : i64, tpu.core_type = #tpu.core_type<tc>, window_params = [{transform_indices = @transform_0, window_bounds = array<i64: 1, 72, 4>}, {transform_indices = @transform_1, window_bounds = array<i64: 1, 72, 4>}, {transform_indices = @transform_2, window_bounds = array<i64: 1, 72, 4>}, {transform_indices = @transform_3, window_bounds = array<i64: 1, 64, 4>}, {transform_indices = @transform_4, window_bounds = array<i64: 1, 64, 4>}, {transform_indices = @transform_5, window_bounds = array<i64: 1, 64, 4>}, {pipeline_mode = #tpu.pipeline_mode<synchronous>, transform_indices = @transform_6, window_bounds = array<i64: 9, 4, 4>}, {pipeline_mode = #tpu.pipeline_mode<synchronous>, transform_indices = @transform_7, window_bounds = array<i64: 1, 4>}, {transform_indices = @transform_8, window_bounds = array<i64: 1, 64, 4>}]} {
    %c0 = arith.constant 0 : index
    %c0_0 = arith.constant 0 : index
    %c0_1 = arith.constant 0 : index
    %0 = vector.load %arg1[%c0, %c0_0, %c0_1] : memref<1x72x4xf32, #tpu.memory_space<vmem>>, vector<1x72x4xf32>
    %1 = vector.shape_cast %0 : vector<1x72x4xf32> to vector<72x4xf32>
    %c0_2 = arith.constant 0 : index
    %c0_3 = arith.constant 0 : index
    %c0_4 = arith.constant 0 : index
    %2 = vector.load %arg4[%c0_2, %c0_3, %c0_4] : memref<1x64x4xf32, #tpu.memory_space<vmem>>, vector<1x64x4xf32>
    %3 = vector.shape_cast %2 : vector<1x64x4xf32> to vector<64x4xf32>
    %c0_5 = arith.constant 0 : index
    %c0_6 = arith.constant 0 : index
    %c0_7 = arith.constant 0 : index
    %4 = vector.load %arg2[%c0_5, %c0_6, %c0_7] : memref<1x72x4xf32, #tpu.memory_space<vmem>>, vector<1x72x4xf32>
    %5 = vector.shape_cast %4 : vector<1x72x4xf32> to vector<72x4xf32>
    %c0_8 = arith.constant 0 : index
    %c0_9 = arith.constant 0 : index
    %c0_10 = arith.constant 0 : index
    %6 = vector.load %arg5[%c0_8, %c0_9, %c0_10] : memref<1x64x4xf32, #tpu.memory_space<vmem>>, vector<1x64x4xf32>
    %7 = vector.shape_cast %6 : vector<1x64x4xf32> to vector<64x4xf32>
    %c0_11 = arith.constant 0 : index
    %c0_12 = arith.constant 0 : index
    %c0_13 = arith.constant 0 : index
    %8 = vector.load %arg3[%c0_11, %c0_12, %c0_13] : memref<1x72x4xf32, #tpu.memory_space<vmem>>, vector<1x72x4xf32>
    %9 = vector.shape_cast %8 : vector<1x72x4xf32> to vector<72x4xf32>
    %c0_14 = arith.constant 0 : index
    %c0_15 = arith.constant 0 : index
    %c0_16 = arith.constant 0 : index
    %10 = vector.load %arg6[%c0_14, %c0_15, %c0_16] : memref<1x64x4xf32, #tpu.memory_space<vmem>>, vector<1x64x4xf32>
    %11 = vector.shape_cast %10 : vector<1x64x4xf32> to vector<64x4xf32>
    %12 = vector.extract_strided_slice %1 {offsets = [0, 0], sizes = [64, 4], strides = [1, 1]} : vector<72x4xf32> to vector<64x4xf32>
    %c0_17 = arith.constant 0 : index
    %c0_18 = arith.constant 0 : index
    %c0_19 = arith.constant 0 : index
    %13 = vector.load %arg7[%c0_17, %c0_18, %c0_19] : memref<9x4x4xf32, #tpu.memory_space<vmem>>, vector<1x4x4xf32>
    %14 = vector.shape_cast %13 : vector<1x4x4xf32> to vector<4x4xf32>
    %cst = arith.constant dense<0.000000e+00> : vector<64x4xf32>
    %15 = tpu.matmul %12, %14, %cst {dimension_numbers = #tpu.dot_dimension_numbers<[1], [0], [0], [1], [0, 0, 1, 1], [], []>} : vector<64x4xf32>, vector<4x4xf32>, vector<64x4xf32> -> vector<64x4xf32>
    %c0_20 = arith.constant 0 : index
    %c0_21 = arith.constant 0 : index
    %16 = vector.load %arg10[%c0_20, %c0_21] : memref<64x4xf32, #tpu.memory_space<vmem>>, vector<64x4xf32>
    tpu.vector_store %arg10[%c0_20, %c0_21], %15 {strides = array<i32>} : memref<64x4xf32, #tpu.memory_space<vmem>>, vector<64x4xf32>,
    %17 = vector.extract_strided_slice %5 {offsets = [0, 0], sizes = [64, 4], strides = [1, 1]} : vector<72x4xf32> to vector<64x4xf32>
    %c1 = arith.constant 1 : index
    %c0_22 = arith.constant 0 : index
    %c0_23 = arith.constant 0 : index
    %18 = vector.load %arg7[%c1, %c0_22, %c0_23] : memref<9x4x4xf32, #tpu.memory_space<vmem>>, vector<1x4x4xf32>
    %19 = vector.shape_cast %18 : vector<1x4x4xf32> to vector<4x4xf32>
    %cst_24 = arith.constant dense<0.000000e+00> : vector<64x4xf32>
    %20 = tpu.matmul %17, %19, %cst_24 {dimension_numbers = #tpu.dot_dimension_numbers<[1], [0], [0], [1], [0, 0, 1, 1], [], []>} : vector<64x4xf32>, vector<4x4xf32>, vector<64x4xf32> -> vector<64x4xf32>
    %c0_25 = arith.constant 0 : index
    %c0_26 = arith.constant 0 : index
    %21 = vector.load %arg10[%c0_25, %c0_26] : memref<64x4xf32, #tpu.memory_space<vmem>>, vector<64x4xf32>
    %22 = arith.addf %21, %20 : vector<64x4xf32>
    %c0_27 = arith.constant 0 : index
    %c0_28 = arith.constant 0 : index
    %23 = vector.load %arg10[%c0_27, %c0_28] : memref<64x4xf32, #tpu.memory_space<vmem>>, vector<64x4xf32>
    tpu.vector_store %arg10[%c0_27, %c0_28], %22 {strides = array<i32>} : memref<64x4xf32, #tpu.memory_space<vmem>>, vector<64x4xf32>,
    %24 = vector.extract_strided_slice %9 {offsets = [0, 0], sizes = [64, 4], strides = [1, 1]} : vector<72x4xf32> to vector<64x4xf32>
    %c2 = arith.constant 2 : index
    %c0_29 = arith.constant 0 : index
    %c0_30 = arith.constant 0 : index
    %25 = vector.load %arg7[%c2, %c0_29, %c0_30] : memref<9x4x4xf32, #tpu.memory_space<vmem>>, vector<1x4x4xf32>
    %26 = vector.shape_cast %25 : vector<1x4x4xf32> to vector<4x4xf32>
    %cst_31 = arith.constant dense<0.000000e+00> : vector<64x4xf32>
    %27 = tpu.matmul %24, %26, %cst_31 {dimension_numbers = #tpu.dot_dimension_numbers<[1], [0], [0], [1], [0, 0, 1, 1], [], []>} : vector<64x4xf32>, vector<4x4xf32>, vector<64x4xf32> -> vector<64x4xf32>
    %c0_32 = arith.constant 0 : index
    %c0_33 = arith.constant 0 : index
    %28 = vector.load %arg10[%c0_32, %c0_33] : memref<64x4xf32, #tpu.memory_space<vmem>>, vector<64x4xf32>
    %29 = arith.addf %28, %27 : vector<64x4xf32>
    %c0_34 = arith.constant 0 : index
    %c0_35 = arith.constant 0 : index
    %30 = vector.load %arg10[%c0_34, %c0_35] : memref<64x4xf32, #tpu.memory_space<vmem>>, vector<64x4xf32>
    tpu.vector_store %arg10[%c0_34, %c0_35], %29 {strides = array<i32>} : memref<64x4xf32, #tpu.memory_space<vmem>>, vector<64x4xf32>,
    %c3 = arith.constant 3 : index
    %c0_36 = arith.constant 0 : index
    %c0_37 = arith.constant 0 : index
    %31 = vector.load %arg7[%c3, %c0_36, %c0_37] : memref<9x4x4xf32, #tpu.memory_space<vmem>>, vector<1x4x4xf32>
    %32 = vector.shape_cast %31 : vector<1x4x4xf32> to vector<4x4xf32>
    %cst_38 = arith.constant dense<0.000000e+00> : vector<64x4xf32>
    %33 = tpu.matmul %3, %32, %cst_38 {dimension_numbers = #tpu.dot_dimension_numbers<[1], [0], [0], [1], [0, 0, 1, 1], [], []>} : vector<64x4xf32>, vector<4x4xf32>, vector<64x4xf32> -> vector<64x4xf32>
    %c0_39 = arith.constant 0 : index
    %c0_40 = arith.constant 0 : index
    %34 = vector.load %arg10[%c0_39, %c0_40] : memref<64x4xf32, #tpu.memory_space<vmem>>, vector<64x4xf32>
    %35 = arith.addf %34, %33 : vector<64x4xf32>
    %c0_41 = arith.constant 0 : index
    %c0_42 = arith.constant 0 : index
    %36 = vector.load %arg10[%c0_41, %c0_42] : memref<64x4xf32, #tpu.memory_space<vmem>>, vector<64x4xf32>
    tpu.vector_store %arg10[%c0_41, %c0_42], %35 {strides = array<i32>} : memref<64x4xf32, #tpu.memory_space<vmem>>, vector<64x4xf32>,
    %c4 = arith.constant 4 : index
    %c0_43 = arith.constant 0 : index
    %c0_44 = arith.constant 0 : index
    %37 = vector.load %arg7[%c4, %c0_43, %c0_44] : memref<9x4x4xf32, #tpu.memory_space<vmem>>, vector<1x4x4xf32>
    %38 = vector.shape_cast %37 : vector<1x4x4xf32> to vector<4x4xf32>
    %cst_45 = arith.constant dense<0.000000e+00> : vector<64x4xf32>
    %39 = tpu.matmul %7, %38, %cst_45 {dimension_numbers = #tpu.dot_dimension_numbers<[1], [0], [0], [1], [0, 0, 1, 1], [], []>} : vector<64x4xf32>, vector<4x4xf32>, vector<64x4xf32> -> vector<64x4xf32>
    %c0_46 = arith.constant 0 : index
    %c0_47 = arith.constant 0 : index
    %40 = vector.load %arg10[%c0_46, %c0_47] : memref<64x4xf32, #tpu.memory_space<vmem>>, vector<64x4xf32>
    %41 = arith.addf %40, %39 : vector<64x4xf32>
    %c0_48 = arith.constant 0 : index
    %c0_49 = arith.constant 0 : index
    %42 = vector.load %arg10[%c0_48, %c0_49] : memref<64x4xf32, #tpu.memory_space<vmem>>, vector<64x4xf32>
    tpu.vector_store %arg10[%c0_48, %c0_49], %41 {strides = array<i32>} : memref<64x4xf32, #tpu.memory_space<vmem>>, vector<64x4xf32>,
    %c5 = arith.constant 5 : index
    %c0_50 = arith.constant 0 : index
    %c0_51 = arith.constant 0 : index
    %43 = vector.load %arg7[%c5, %c0_50, %c0_51] : memref<9x4x4xf32, #tpu.memory_space<vmem>>, vector<1x4x4xf32>
    %44 = vector.shape_cast %43 : vector<1x4x4xf32> to vector<4x4xf32>
    %cst_52 = arith.constant dense<0.000000e+00> : vector<64x4xf32>
    %45 = tpu.matmul %11, %44, %cst_52 {dimension_numbers = #tpu.dot_dimension_numbers<[1], [0], [0], [1], [0, 0, 1, 1], [], []>} : vector<64x4xf32>, vector<4x4xf32>, vector<64x4xf32> -> vector<64x4xf32>
    %c0_53 = arith.constant 0 : index
    %c0_54 = arith.constant 0 : index
    %46 = vector.load %arg10[%c0_53, %c0_54] : memref<64x4xf32, #tpu.memory_space<vmem>>, vector<64x4xf32>
    %47 = arith.addf %46, %45 : vector<64x4xf32>
    %c0_55 = arith.constant 0 : index
    %c0_56 = arith.constant 0 : index
    %48 = vector.load %arg10[%c0_55, %c0_56] : memref<64x4xf32, #tpu.memory_space<vmem>>, vector<64x4xf32>
    tpu.vector_store %arg10[%c0_55, %c0_56], %47 {strides = array<i32>} : memref<64x4xf32, #tpu.memory_space<vmem>>, vector<64x4xf32>,
    %49 = vector.extract_strided_slice %1 {offsets = [8, 0], sizes = [64, 4], strides = [1, 1]} : vector<72x4xf32> to vector<64x4xf32>
    %c6 = arith.constant 6 : index
    %c0_57 = arith.constant 0 : index
    %c0_58 = arith.constant 0 : index
    %50 = vector.load %arg7[%c6, %c0_57, %c0_58] : memref<9x4x4xf32, #tpu.memory_space<vmem>>, vector<1x4x4xf32>
    %51 = vector.shape_cast %50 : vector<1x4x4xf32> to vector<4x4xf32>
    %cst_59 = arith.constant dense<0.000000e+00> : vector<64x4xf32>
    %52 = tpu.matmul %49, %51, %cst_59 {dimension_numbers = #tpu.dot_dimension_numbers<[1], [0], [0], [1], [0, 0, 1, 1], [], []>} : vector<64x4xf32>, vector<4x4xf32>, vector<64x4xf32> -> vector<64x4xf32>
    %c0_60 = arith.constant 0 : index
    %c0_61 = arith.constant 0 : index
    %53 = vector.load %arg10[%c0_60, %c0_61] : memref<64x4xf32, #tpu.memory_space<vmem>>, vector<64x4xf32>
    %54 = arith.addf %53, %52 : vector<64x4xf32>
    %c0_62 = arith.constant 0 : index
    %c0_63 = arith.constant 0 : index
    %55 = vector.load %arg10[%c0_62, %c0_63] : memref<64x4xf32, #tpu.memory_space<vmem>>, vector<64x4xf32>
    tpu.vector_store %arg10[%c0_62, %c0_63], %54 {strides = array<i32>} : memref<64x4xf32, #tpu.memory_space<vmem>>, vector<64x4xf32>,
    %56 = vector.extract_strided_slice %5 {offsets = [8, 0], sizes = [64, 4], strides = [1, 1]} : vector<72x4xf32> to vector<64x4xf32>
    %c7 = arith.constant 7 : index
    %c0_64 = arith.constant 0 : index
    %c0_65 = arith.constant 0 : index
    %57 = vector.load %arg7[%c7, %c0_64, %c0_65] : memref<9x4x4xf32, #tpu.memory_space<vmem>>, vector<1x4x4xf32>
    %58 = vector.shape_cast %57 : vector<1x4x4xf32> to vector<4x4xf32>
    %cst_66 = arith.constant dense<0.000000e+00> : vector<64x4xf32>
    %59 = tpu.matmul %56, %58, %cst_66 {dimension_numbers = #tpu.dot_dimension_numbers<[1], [0], [0], [1], [0, 0, 1, 1], [], []>} : vector<64x4xf32>, vector<4x4xf32>, vector<64x4xf32> -> vector<64x4xf32>
    %c0_67 = arith.constant 0 : index
    %c0_68 = arith.constant 0 : index
    %60 = vector.load %arg10[%c0_67, %c0_68] : memref<64x4xf32, #tpu.memory_space<vmem>>, vector<64x4xf32>
    %61 = arith.addf %60, %59 : vector<64x4xf32>
    %c0_69 = arith.constant 0 : index
    %c0_70 = arith.constant 0 : index
    %62 = vector.load %arg10[%c0_69, %c0_70] : memref<64x4xf32, #tpu.memory_space<vmem>>, vector<64x4xf32>
    tpu.vector_store %arg10[%c0_69, %c0_70], %61 {strides = array<i32>} : memref<64x4xf32, #tpu.memory_space<vmem>>, vector<64x4xf32>,
    %63 = vector.extract_strided_slice %9 {offsets = [8, 0], sizes = [64, 4], strides = [1, 1]} : vector<72x4xf32> to vector<64x4xf32>
    %c8 = arith.constant 8 : index
    %c0_71 = arith.constant 0 : index
    %c0_72 = arith.constant 0 : index
    %64 = vector.load %arg7[%c8, %c0_71, %c0_72] : memref<9x4x4xf32, #tpu.memory_space<vmem>>, vector<1x4x4xf32>
    %65 = vector.shape_cast %64 : vector<1x4x4xf32> to vector<4x4xf32>
    %cst_73 = arith.constant dense<0.000000e+00> : vector<64x4xf32>
    %66 = tpu.matmul %63, %65, %cst_73 {dimension_numbers = #tpu.dot_dimension_numbers<[1], [0], [0], [1], [0, 0, 1, 1], [], []>} : vector<64x4xf32>, vector<4x4xf32>, vector<64x4xf32> -> vector<64x4xf32>
    %c0_74 = arith.constant 0 : index
    %c0_75 = arith.constant 0 : index
    %67 = vector.load %arg10[%c0_74, %c0_75] : memref<64x4xf32, #tpu.memory_space<vmem>>, vector<64x4xf32>
    %68 = arith.addf %67, %66 : vector<64x4xf32>
    %c0_76 = arith.constant 0 : index
    %c0_77 = arith.constant 0 : index
    %69 = vector.load %arg10[%c0_76, %c0_77] : memref<64x4xf32, #tpu.memory_space<vmem>>, vector<64x4xf32>
    tpu.vector_store %arg10[%c0_76, %c0_77], %68 {strides = array<i32>} : memref<64x4xf32, #tpu.memory_space<vmem>>, vector<64x4xf32>,
    %c0_78 = arith.constant 0 : index
    %c0_79 = arith.constant 0 : index
    %70 = vector.load %arg10[%c0_78, %c0_79] : memref<64x4xf32, #tpu.memory_space<vmem>>, vector<64x4xf32>
    %c0_80 = arith.constant 0 : index
    %c0_81 = arith.constant 0 : index
    %71 = vector.load %arg8[%c0_80, %c0_81] : memref<1x4xf32, #tpu.memory_space<vmem>>, vector<1x4xf32>
    %72 = vector.broadcast %71 : vector<1x4xf32> to vector<64x4xf32>
    %73 = arith.addf %70, %72 : vector<64x4xf32>
    %c0_82 = arith.constant 0 : index
    %c0_83 = arith.constant 0 : index
    %c0_84 = arith.constant 0 : index
    %74 = vector.load %arg9[%c0_82, %c0_83, %c0_84] : memref<1x64x4xf32, #tpu.memory_space<vmem>>, vector<1x64x4xf32>
    %75 = vector.shape_cast %74 : vector<1x64x4xf32> to vector<64x4xf32>
    %76 = vector.shape_cast %73 : vector<64x4xf32> to vector<1x64x4xf32>
    tpu.vector_store %arg9[%c0_82, %c0_83, %c0_84], %76 {strides = array<i32>} : memref<1x64x4xf32, #tpu.memory_space<vmem>>, vector<1x64x4xf32>,
    return
  }
  func.func @transform_0(%arg0: i32) -> (i32, i32, i32) {
    %c0_i32 = arith.constant 0 : i32
    %c0_i32_0 = arith.constant 0 : i32
    %c0_i32_1 = arith.constant 0 : i32
    return %arg0, %c0_i32, %c0_i32_0 : i32, i32, i32
  }
  func.func @transform_1(%arg0: i32) -> (i32, i32, i32) {
    %c0_i32 = arith.constant 0 : i32
    %c0_i32_0 = arith.constant 0 : i32
    %c0_i32_1 = arith.constant 0 : i32
    return %arg0, %c0_i32, %c0_i32_0 : i32, i32, i32
  }
  func.func @transform_2(%arg0: i32) -> (i32, i32, i32) {
    %c0_i32 = arith.constant 0 : i32
    %c0_i32_0 = arith.constant 0 : i32
    %c0_i32_1 = arith.constant 0 : i32
    return %arg0, %c0_i32, %c0_i32_0 : i32, i32, i32
  }
  func.func @transform_3(%arg0: i32) -> (i32, i32, i32) {
    %c0_i32 = arith.constant 0 : i32
    %c0_i32_0 = arith.constant 0 : i32
    %c0_i32_1 = arith.constant 0 : i32
    return %arg0, %c0_i32, %c0_i32_0 : i32, i32, i32
  }
  func.func @transform_4(%arg0: i32) -> (i32, i32, i32) {
    %c0_i32 = arith.constant 0 : i32
    %c0_i32_0 = arith.constant 0 : i32
    %c0_i32_1 = arith.constant 0 : i32
    return %arg0, %c0_i32, %c0_i32_0 : i32, i32, i32
  }
  func.func @transform_5(%arg0: i32) -> (i32, i32, i32) {
    %c0_i32 = arith.constant 0 : i32
    %c0_i32_0 = arith.constant 0 : i32
    %c0_i32_1 = arith.constant 0 : i32
    return %arg0, %c0_i32, %c0_i32_0 : i32, i32, i32
  }
  func.func @transform_6(%arg0: i32) -> (i32, i32, i32) {
    %c0_i32 = arith.constant 0 : i32
    %c0_i32_0 = arith.constant 0 : i32
    %c0_i32_1 = arith.constant 0 : i32
    %c0_i32_2 = arith.constant 0 : i32
    return %c0_i32, %c0_i32_0, %c0_i32_1 : i32, i32, i32
  }
  func.func @transform_7(%arg0: i32) -> (i32, i32) {
    %c0_i32 = arith.constant 0 : i32
    %c0_i32_0 = arith.constant 0 : i32
    %c0_i32_1 = arith.constant 0 : i32
    return %c0_i32, %c0_i32_0 : i32, i32
  }
  func.func @transform_8(%arg0: i32) -> (i32, i32, i32) {
    %c0_i32 = arith.constant 0 : i32
    %c0_i32_0 = arith.constant 0 : i32
    %c0_i32_1 = arith.constant 0 : i32
    return %arg0, %c0_i32, %c0_i32_0 : i32, i32, i32
  }
}

module attributes {stable_mosaic.version = 11 : i64} {
  func.func @_conv3x3_s2_kernel(%arg0: i32, %arg1: memref<1x20x4xf32, #tpu.memory_space<vmem>>, %arg2: memref<1x20x4xf32, #tpu.memory_space<vmem>>, %arg3: memref<1x20x4xf32, #tpu.memory_space<vmem>>, %arg4: memref<1x16x4xf32, #tpu.memory_space<vmem>>, %arg5: memref<1x16x4xf32, #tpu.memory_space<vmem>>, %arg6: memref<1x16x4xf32, #tpu.memory_space<vmem>>, %arg7: memref<9x4x4xf32, #tpu.memory_space<vmem>>, %arg8: memref<1x4xf32, #tpu.memory_space<vmem>>, %arg9: memref<1x16x4xf32, #tpu.memory_space<vmem>>, %arg10: memref<16x4xf32, #tpu.memory_space<vmem>>) attributes {dimension_semantics = [#tpu.dimension_semantics<parallel>], iteration_bounds = array<i64: 2>, scalar_prefetch = 0 : i64, scratch_operands = 1 : i64, tpu.core_type = #tpu.core_type<tc>, window_params = [{transform_indices = @transform_0, window_bounds = array<i64: 1, 20, 4>}, {transform_indices = @transform_1, window_bounds = array<i64: 1, 20, 4>}, {transform_indices = @transform_2, window_bounds = array<i64: 1, 20, 4>}, {transform_indices = @transform_3, window_bounds = array<i64: 1, 16, 4>}, {transform_indices = @transform_4, window_bounds = array<i64: 1, 16, 4>}, {transform_indices = @transform_5, window_bounds = array<i64: 1, 16, 4>}, {pipeline_mode = #tpu.pipeline_mode<synchronous>, transform_indices = @transform_6, window_bounds = array<i64: 9, 4, 4>}, {pipeline_mode = #tpu.pipeline_mode<synchronous>, transform_indices = @transform_7, window_bounds = array<i64: 1, 4>}, {transform_indices = @transform_8, window_bounds = array<i64: 1, 16, 4>}]} {
    %c0 = arith.constant 0 : index
    %c0_0 = arith.constant 0 : index
    %c0_1 = arith.constant 0 : index
    %0 = vector.load %arg1[%c0, %c0_0, %c0_1] : memref<1x20x4xf32, #tpu.memory_space<vmem>>, vector<1x20x4xf32>
    %1 = vector.shape_cast %0 : vector<1x20x4xf32> to vector<20x4xf32>
    %c0_2 = arith.constant 0 : index
    %c0_3 = arith.constant 0 : index
    %c0_4 = arith.constant 0 : index
    %2 = vector.load %arg4[%c0_2, %c0_3, %c0_4] : memref<1x16x4xf32, #tpu.memory_space<vmem>>, vector<1x16x4xf32>
    %3 = vector.shape_cast %2 : vector<1x16x4xf32> to vector<16x4xf32>
    %cst = arith.constant 0.000000e+00 : f32
    %4 = vector.broadcast %cst : f32 to vector<20x4xf32>
    %5 = arith.maximumf %1, %4 : vector<20x4xf32>
    %cst_5 = arith.constant 0.000000e+00 : f32
    %6 = vector.broadcast %cst_5 : f32 to vector<16x4xf32>
    %7 = arith.maximumf %3, %6 : vector<16x4xf32>
    %c0_6 = arith.constant 0 : index
    %c0_7 = arith.constant 0 : index
    %c0_8 = arith.constant 0 : index
    %8 = vector.load %arg2[%c0_6, %c0_7, %c0_8] : memref<1x20x4xf32, #tpu.memory_space<vmem>>, vector<1x20x4xf32>
    %9 = vector.shape_cast %8 : vector<1x20x4xf32> to vector<20x4xf32>
    %c0_9 = arith.constant 0 : index
    %c0_10 = arith.constant 0 : index
    %c0_11 = arith.constant 0 : index
    %10 = vector.load %arg5[%c0_9, %c0_10, %c0_11] : memref<1x16x4xf32, #tpu.memory_space<vmem>>, vector<1x16x4xf32>
    %11 = vector.shape_cast %10 : vector<1x16x4xf32> to vector<16x4xf32>
    %cst_12 = arith.constant 0.000000e+00 : f32
    %12 = vector.broadcast %cst_12 : f32 to vector<20x4xf32>
    %13 = arith.maximumf %9, %12 : vector<20x4xf32>
    %cst_13 = arith.constant 0.000000e+00 : f32
    %14 = vector.broadcast %cst_13 : f32 to vector<16x4xf32>
    %15 = arith.maximumf %11, %14 : vector<16x4xf32>
    %c0_14 = arith.constant 0 : index
    %c0_15 = arith.constant 0 : index
    %c0_16 = arith.constant 0 : index
    %16 = vector.load %arg3[%c0_14, %c0_15, %c0_16] : memref<1x20x4xf32, #tpu.memory_space<vmem>>, vector<1x20x4xf32>
    %17 = vector.shape_cast %16 : vector<1x20x4xf32> to vector<20x4xf32>
    %c0_17 = arith.constant 0 : index
    %c0_18 = arith.constant 0 : index
    %c0_19 = arith.constant 0 : index
    %18 = vector.load %arg6[%c0_17, %c0_18, %c0_19] : memref<1x16x4xf32, #tpu.memory_space<vmem>>, vector<1x16x4xf32>
    %19 = vector.shape_cast %18 : vector<1x16x4xf32> to vector<16x4xf32>
    %cst_20 = arith.constant 0.000000e+00 : f32
    %20 = vector.broadcast %cst_20 : f32 to vector<20x4xf32>
    %21 = arith.maximumf %17, %20 : vector<20x4xf32>
    %cst_21 = arith.constant 0.000000e+00 : f32
    %22 = vector.broadcast %cst_21 : f32 to vector<16x4xf32>
    %23 = arith.maximumf %19, %22 : vector<16x4xf32>
    %24 = vector.extract_strided_slice %5 {offsets = [0, 0], sizes = [16, 4], strides = [1, 1]} : vector<20x4xf32> to vector<16x4xf32>
    %c0_22 = arith.constant 0 : index
    %c0_23 = arith.constant 0 : index
    %c0_24 = arith.constant 0 : index
    %25 = vector.load %arg7[%c0_22, %c0_23, %c0_24] : memref<9x4x4xf32, #tpu.memory_space<vmem>>, vector<1x4x4xf32>
    %26 = vector.shape_cast %25 : vector<1x4x4xf32> to vector<4x4xf32>
    %cst_25 = arith.constant dense<0.000000e+00> : vector<16x4xf32>
    %27 = tpu.matmul %24, %26, %cst_25 {dimension_numbers = #tpu.dot_dimension_numbers<[1], [0], [0], [1], [0, 0, 1, 1], [], []>} : vector<16x4xf32>, vector<4x4xf32>, vector<16x4xf32> -> vector<16x4xf32>
    %c0_26 = arith.constant 0 : index
    %c0_27 = arith.constant 0 : index
    %28 = vector.load %arg10[%c0_26, %c0_27] : memref<16x4xf32, #tpu.memory_space<vmem>>, vector<16x4xf32>
    tpu.vector_store %arg10[%c0_26, %c0_27], %27 {strides = array<i32>} : memref<16x4xf32, #tpu.memory_space<vmem>>, vector<16x4xf32>,
    %29 = vector.extract_strided_slice %13 {offsets = [0, 0], sizes = [16, 4], strides = [1, 1]} : vector<20x4xf32> to vector<16x4xf32>
    %c1 = arith.constant 1 : index
    %c0_28 = arith.constant 0 : index
    %c0_29 = arith.constant 0 : index
    %30 = vector.load %arg7[%c1, %c0_28, %c0_29] : memref<9x4x4xf32, #tpu.memory_space<vmem>>, vector<1x4x4xf32>
    %31 = vector.shape_cast %30 : vector<1x4x4xf32> to vector<4x4xf32>
    %cst_30 = arith.constant dense<0.000000e+00> : vector<16x4xf32>
    %32 = tpu.matmul %29, %31, %cst_30 {dimension_numbers = #tpu.dot_dimension_numbers<[1], [0], [0], [1], [0, 0, 1, 1], [], []>} : vector<16x4xf32>, vector<4x4xf32>, vector<16x4xf32> -> vector<16x4xf32>
    %c0_31 = arith.constant 0 : index
    %c0_32 = arith.constant 0 : index
    %33 = vector.load %arg10[%c0_31, %c0_32] : memref<16x4xf32, #tpu.memory_space<vmem>>, vector<16x4xf32>
    %34 = arith.addf %33, %32 : vector<16x4xf32>
    %c0_33 = arith.constant 0 : index
    %c0_34 = arith.constant 0 : index
    %35 = vector.load %arg10[%c0_33, %c0_34] : memref<16x4xf32, #tpu.memory_space<vmem>>, vector<16x4xf32>
    tpu.vector_store %arg10[%c0_33, %c0_34], %34 {strides = array<i32>} : memref<16x4xf32, #tpu.memory_space<vmem>>, vector<16x4xf32>,
    %36 = vector.extract_strided_slice %21 {offsets = [0, 0], sizes = [16, 4], strides = [1, 1]} : vector<20x4xf32> to vector<16x4xf32>
    %c2 = arith.constant 2 : index
    %c0_35 = arith.constant 0 : index
    %c0_36 = arith.constant 0 : index
    %37 = vector.load %arg7[%c2, %c0_35, %c0_36] : memref<9x4x4xf32, #tpu.memory_space<vmem>>, vector<1x4x4xf32>
    %38 = vector.shape_cast %37 : vector<1x4x4xf32> to vector<4x4xf32>
    %cst_37 = arith.constant dense<0.000000e+00> : vector<16x4xf32>
    %39 = tpu.matmul %36, %38, %cst_37 {dimension_numbers = #tpu.dot_dimension_numbers<[1], [0], [0], [1], [0, 0, 1, 1], [], []>} : vector<16x4xf32>, vector<4x4xf32>, vector<16x4xf32> -> vector<16x4xf32>
    %c0_38 = arith.constant 0 : index
    %c0_39 = arith.constant 0 : index
    %40 = vector.load %arg10[%c0_38, %c0_39] : memref<16x4xf32, #tpu.memory_space<vmem>>, vector<16x4xf32>
    %41 = arith.addf %40, %39 : vector<16x4xf32>
    %c0_40 = arith.constant 0 : index
    %c0_41 = arith.constant 0 : index
    %42 = vector.load %arg10[%c0_40, %c0_41] : memref<16x4xf32, #tpu.memory_space<vmem>>, vector<16x4xf32>
    tpu.vector_store %arg10[%c0_40, %c0_41], %41 {strides = array<i32>} : memref<16x4xf32, #tpu.memory_space<vmem>>, vector<16x4xf32>,
    %c3 = arith.constant 3 : index
    %c0_42 = arith.constant 0 : index
    %c0_43 = arith.constant 0 : index
    %43 = vector.load %arg7[%c3, %c0_42, %c0_43] : memref<9x4x4xf32, #tpu.memory_space<vmem>>, vector<1x4x4xf32>
    %44 = vector.shape_cast %43 : vector<1x4x4xf32> to vector<4x4xf32>
    %cst_44 = arith.constant dense<0.000000e+00> : vector<16x4xf32>
    %45 = tpu.matmul %7, %44, %cst_44 {dimension_numbers = #tpu.dot_dimension_numbers<[1], [0], [0], [1], [0, 0, 1, 1], [], []>} : vector<16x4xf32>, vector<4x4xf32>, vector<16x4xf32> -> vector<16x4xf32>
    %c0_45 = arith.constant 0 : index
    %c0_46 = arith.constant 0 : index
    %46 = vector.load %arg10[%c0_45, %c0_46] : memref<16x4xf32, #tpu.memory_space<vmem>>, vector<16x4xf32>
    %47 = arith.addf %46, %45 : vector<16x4xf32>
    %c0_47 = arith.constant 0 : index
    %c0_48 = arith.constant 0 : index
    %48 = vector.load %arg10[%c0_47, %c0_48] : memref<16x4xf32, #tpu.memory_space<vmem>>, vector<16x4xf32>
    tpu.vector_store %arg10[%c0_47, %c0_48], %47 {strides = array<i32>} : memref<16x4xf32, #tpu.memory_space<vmem>>, vector<16x4xf32>,
    %c4 = arith.constant 4 : index
    %c0_49 = arith.constant 0 : index
    %c0_50 = arith.constant 0 : index
    %49 = vector.load %arg7[%c4, %c0_49, %c0_50] : memref<9x4x4xf32, #tpu.memory_space<vmem>>, vector<1x4x4xf32>
    %50 = vector.shape_cast %49 : vector<1x4x4xf32> to vector<4x4xf32>
    %cst_51 = arith.constant dense<0.000000e+00> : vector<16x4xf32>
    %51 = tpu.matmul %15, %50, %cst_51 {dimension_numbers = #tpu.dot_dimension_numbers<[1], [0], [0], [1], [0, 0, 1, 1], [], []>} : vector<16x4xf32>, vector<4x4xf32>, vector<16x4xf32> -> vector<16x4xf32>
    %c0_52 = arith.constant 0 : index
    %c0_53 = arith.constant 0 : index
    %52 = vector.load %arg10[%c0_52, %c0_53] : memref<16x4xf32, #tpu.memory_space<vmem>>, vector<16x4xf32>
    %53 = arith.addf %52, %51 : vector<16x4xf32>
    %c0_54 = arith.constant 0 : index
    %c0_55 = arith.constant 0 : index
    %54 = vector.load %arg10[%c0_54, %c0_55] : memref<16x4xf32, #tpu.memory_space<vmem>>, vector<16x4xf32>
    tpu.vector_store %arg10[%c0_54, %c0_55], %53 {strides = array<i32>} : memref<16x4xf32, #tpu.memory_space<vmem>>, vector<16x4xf32>,
    %c5 = arith.constant 5 : index
    %c0_56 = arith.constant 0 : index
    %c0_57 = arith.constant 0 : index
    %55 = vector.load %arg7[%c5, %c0_56, %c0_57] : memref<9x4x4xf32, #tpu.memory_space<vmem>>, vector<1x4x4xf32>
    %56 = vector.shape_cast %55 : vector<1x4x4xf32> to vector<4x4xf32>
    %cst_58 = arith.constant dense<0.000000e+00> : vector<16x4xf32>
    %57 = tpu.matmul %23, %56, %cst_58 {dimension_numbers = #tpu.dot_dimension_numbers<[1], [0], [0], [1], [0, 0, 1, 1], [], []>} : vector<16x4xf32>, vector<4x4xf32>, vector<16x4xf32> -> vector<16x4xf32>
    %c0_59 = arith.constant 0 : index
    %c0_60 = arith.constant 0 : index
    %58 = vector.load %arg10[%c0_59, %c0_60] : memref<16x4xf32, #tpu.memory_space<vmem>>, vector<16x4xf32>
    %59 = arith.addf %58, %57 : vector<16x4xf32>
    %c0_61 = arith.constant 0 : index
    %c0_62 = arith.constant 0 : index
    %60 = vector.load %arg10[%c0_61, %c0_62] : memref<16x4xf32, #tpu.memory_space<vmem>>, vector<16x4xf32>
    tpu.vector_store %arg10[%c0_61, %c0_62], %59 {strides = array<i32>} : memref<16x4xf32, #tpu.memory_space<vmem>>, vector<16x4xf32>,
    %61 = vector.extract_strided_slice %5 {offsets = [4, 0], sizes = [16, 4], strides = [1, 1]} : vector<20x4xf32> to vector<16x4xf32>
    %c6 = arith.constant 6 : index
    %c0_63 = arith.constant 0 : index
    %c0_64 = arith.constant 0 : index
    %62 = vector.load %arg7[%c6, %c0_63, %c0_64] : memref<9x4x4xf32, #tpu.memory_space<vmem>>, vector<1x4x4xf32>
    %63 = vector.shape_cast %62 : vector<1x4x4xf32> to vector<4x4xf32>
    %cst_65 = arith.constant dense<0.000000e+00> : vector<16x4xf32>
    %64 = tpu.matmul %61, %63, %cst_65 {dimension_numbers = #tpu.dot_dimension_numbers<[1], [0], [0], [1], [0, 0, 1, 1], [], []>} : vector<16x4xf32>, vector<4x4xf32>, vector<16x4xf32> -> vector<16x4xf32>
    %c0_66 = arith.constant 0 : index
    %c0_67 = arith.constant 0 : index
    %65 = vector.load %arg10[%c0_66, %c0_67] : memref<16x4xf32, #tpu.memory_space<vmem>>, vector<16x4xf32>
    %66 = arith.addf %65, %64 : vector<16x4xf32>
    %c0_68 = arith.constant 0 : index
    %c0_69 = arith.constant 0 : index
    %67 = vector.load %arg10[%c0_68, %c0_69] : memref<16x4xf32, #tpu.memory_space<vmem>>, vector<16x4xf32>
    tpu.vector_store %arg10[%c0_68, %c0_69], %66 {strides = array<i32>} : memref<16x4xf32, #tpu.memory_space<vmem>>, vector<16x4xf32>,
    %68 = vector.extract_strided_slice %13 {offsets = [4, 0], sizes = [16, 4], strides = [1, 1]} : vector<20x4xf32> to vector<16x4xf32>
    %c7 = arith.constant 7 : index
    %c0_70 = arith.constant 0 : index
    %c0_71 = arith.constant 0 : index
    %69 = vector.load %arg7[%c7, %c0_70, %c0_71] : memref<9x4x4xf32, #tpu.memory_space<vmem>>, vector<1x4x4xf32>
    %70 = vector.shape_cast %69 : vector<1x4x4xf32> to vector<4x4xf32>
    %cst_72 = arith.constant dense<0.000000e+00> : vector<16x4xf32>
    %71 = tpu.matmul %68, %70, %cst_72 {dimension_numbers = #tpu.dot_dimension_numbers<[1], [0], [0], [1], [0, 0, 1, 1], [], []>} : vector<16x4xf32>, vector<4x4xf32>, vector<16x4xf32> -> vector<16x4xf32>
    %c0_73 = arith.constant 0 : index
    %c0_74 = arith.constant 0 : index
    %72 = vector.load %arg10[%c0_73, %c0_74] : memref<16x4xf32, #tpu.memory_space<vmem>>, vector<16x4xf32>
    %73 = arith.addf %72, %71 : vector<16x4xf32>
    %c0_75 = arith.constant 0 : index
    %c0_76 = arith.constant 0 : index
    %74 = vector.load %arg10[%c0_75, %c0_76] : memref<16x4xf32, #tpu.memory_space<vmem>>, vector<16x4xf32>
    tpu.vector_store %arg10[%c0_75, %c0_76], %73 {strides = array<i32>} : memref<16x4xf32, #tpu.memory_space<vmem>>, vector<16x4xf32>,
    %75 = vector.extract_strided_slice %21 {offsets = [4, 0], sizes = [16, 4], strides = [1, 1]} : vector<20x4xf32> to vector<16x4xf32>
    %c8 = arith.constant 8 : index
    %c0_77 = arith.constant 0 : index
    %c0_78 = arith.constant 0 : index
    %76 = vector.load %arg7[%c8, %c0_77, %c0_78] : memref<9x4x4xf32, #tpu.memory_space<vmem>>, vector<1x4x4xf32>
    %77 = vector.shape_cast %76 : vector<1x4x4xf32> to vector<4x4xf32>
    %cst_79 = arith.constant dense<0.000000e+00> : vector<16x4xf32>
    %78 = tpu.matmul %75, %77, %cst_79 {dimension_numbers = #tpu.dot_dimension_numbers<[1], [0], [0], [1], [0, 0, 1, 1], [], []>} : vector<16x4xf32>, vector<4x4xf32>, vector<16x4xf32> -> vector<16x4xf32>
    %c0_80 = arith.constant 0 : index
    %c0_81 = arith.constant 0 : index
    %79 = vector.load %arg10[%c0_80, %c0_81] : memref<16x4xf32, #tpu.memory_space<vmem>>, vector<16x4xf32>
    %80 = arith.addf %79, %78 : vector<16x4xf32>
    %c0_82 = arith.constant 0 : index
    %c0_83 = arith.constant 0 : index
    %81 = vector.load %arg10[%c0_82, %c0_83] : memref<16x4xf32, #tpu.memory_space<vmem>>, vector<16x4xf32>
    tpu.vector_store %arg10[%c0_82, %c0_83], %80 {strides = array<i32>} : memref<16x4xf32, #tpu.memory_space<vmem>>, vector<16x4xf32>,
    %c0_84 = arith.constant 0 : index
    %c0_85 = arith.constant 0 : index
    %82 = vector.load %arg10[%c0_84, %c0_85] : memref<16x4xf32, #tpu.memory_space<vmem>>, vector<16x4xf32>
    %c0_86 = arith.constant 0 : index
    %c0_87 = arith.constant 0 : index
    %83 = vector.load %arg8[%c0_86, %c0_87] : memref<1x4xf32, #tpu.memory_space<vmem>>, vector<1x4xf32>
    %84 = vector.broadcast %83 : vector<1x4xf32> to vector<16x4xf32>
    %85 = arith.addf %82, %84 : vector<16x4xf32>
    %c0_88 = arith.constant 0 : index
    %c0_89 = arith.constant 0 : index
    %c0_90 = arith.constant 0 : index
    %86 = vector.load %arg9[%c0_88, %c0_89, %c0_90] : memref<1x16x4xf32, #tpu.memory_space<vmem>>, vector<1x16x4xf32>
    %87 = vector.shape_cast %86 : vector<1x16x4xf32> to vector<16x4xf32>
    %88 = vector.shape_cast %85 : vector<16x4xf32> to vector<1x16x4xf32>
    tpu.vector_store %arg9[%c0_88, %c0_89, %c0_90], %88 {strides = array<i32>} : memref<1x16x4xf32, #tpu.memory_space<vmem>>, vector<1x16x4xf32>,
    return
  }
  func.func @transform_0(%arg0: i32) -> (i32, i32, i32) {
    %c0_i32 = arith.constant 0 : i32
    %c0_i32_0 = arith.constant 0 : i32
    %c0_i32_1 = arith.constant 0 : i32
    return %arg0, %c0_i32, %c0_i32_0 : i32, i32, i32
  }
  func.func @transform_1(%arg0: i32) -> (i32, i32, i32) {
    %c0_i32 = arith.constant 0 : i32
    %c0_i32_0 = arith.constant 0 : i32
    %c0_i32_1 = arith.constant 0 : i32
    return %arg0, %c0_i32, %c0_i32_0 : i32, i32, i32
  }
  func.func @transform_2(%arg0: i32) -> (i32, i32, i32) {
    %c0_i32 = arith.constant 0 : i32
    %c0_i32_0 = arith.constant 0 : i32
    %c0_i32_1 = arith.constant 0 : i32
    return %arg0, %c0_i32, %c0_i32_0 : i32, i32, i32
  }
  func.func @transform_3(%arg0: i32) -> (i32, i32, i32) {
    %c0_i32 = arith.constant 0 : i32
    %c0_i32_0 = arith.constant 0 : i32
    %c0_i32_1 = arith.constant 0 : i32
    return %arg0, %c0_i32, %c0_i32_0 : i32, i32, i32
  }
  func.func @transform_4(%arg0: i32) -> (i32, i32, i32) {
    %c0_i32 = arith.constant 0 : i32
    %c0_i32_0 = arith.constant 0 : i32
    %c0_i32_1 = arith.constant 0 : i32
    return %arg0, %c0_i32, %c0_i32_0 : i32, i32, i32
  }
  func.func @transform_5(%arg0: i32) -> (i32, i32, i32) {
    %c0_i32 = arith.constant 0 : i32
    %c0_i32_0 = arith.constant 0 : i32
    %c0_i32_1 = arith.constant 0 : i32
    return %arg0, %c0_i32, %c0_i32_0 : i32, i32, i32
  }
  func.func @transform_6(%arg0: i32) -> (i32, i32, i32) {
    %c0_i32 = arith.constant 0 : i32
    %c0_i32_0 = arith.constant 0 : i32
    %c0_i32_1 = arith.constant 0 : i32
    %c0_i32_2 = arith.constant 0 : i32
    return %c0_i32, %c0_i32_0, %c0_i32_1 : i32, i32, i32
  }
  func.func @transform_7(%arg0: i32) -> (i32, i32) {
    %c0_i32 = arith.constant 0 : i32
    %c0_i32_0 = arith.constant 0 : i32
    %c0_i32_1 = arith.constant 0 : i32
    return %c0_i32, %c0_i32_0 : i32, i32
  }
  func.func @transform_8(%arg0: i32) -> (i32, i32, i32) {
    %c0_i32 = arith.constant 0 : i32
    %c0_i32_0 = arith.constant 0 : i32
    %c0_i32_1 = arith.constant 0 : i32
    return %arg0, %c0_i32, %c0_i32_0 : i32, i32, i32
  }
}

</mosaic_0001>

<bundles_post_ra>
// kernel: _lambda_.2
= control target key start
LH: loop header
LB: loop body
LE: loop exit
PB: predicated region body
PF: predicated region fallthrough
CT: control target
= control target key end

     0   :  { %s2330_s27 = smov 0   ;;  %s2752_s0 = inlined_call_operand.vmem [shape: f32[2,72,4], index: 0, kind: input, shape index: {}]   ;;  %s2753_s1 = inlined_call_operand.vmem [shape: f32[2,72,4], index: 1, kind: input, shape index: {}]   ;;  %s2754_s2 = inlined_call_operand.vmem [shape: f32[2,72,4], index: 2, kind: input, shape index: {}]   ;;  %s2755_s3 = inlined_call_operand.vmem [shape: f32[2,64,4], index: 3, kind: input, shape index: {}]   ;;  %s2756_s4 = inlined_call_operand.vmem [shape: f32[2,64,4], index: 4, kind: input, shape index: {}]   ;;  %s2757_s5 = inlined_call_operand.vmem [shape: f32[2,64,4], index: 5, kind: input, shape index: {}]   ;;  %s2758_s6 = inlined_call_operand.vmem [shape: f32[9,4,4], index: 6, kind: input, shape index: {}]   ;;  %s2759_s7 = inlined_call_operand.vmem [shape: f32[1,4], index: 7, kind: input, shape index: {}]   ;;  %s2760_s8 = inlined_call_operand.vmem [shape: f32[2,64,4], index: 8, kind: output, shape index: {}]  }
   0x1 LB: > { %s1947_s28 = sadd.s32 4294967295, %s2283_s27   ;;  %p1951_p0 = scmp.ge.s32.totalorder %s2283_s27, 1  ;;  %s2283_s27 = sphi %s2330_s27, %s18_s27  }
   0x2   : > { %p312_p1 = scmp.lt.s32.totalorder %s2283_s27, 3 }
   0x4   : > { %p313_p2 = pnand %p1951_p0, %p312_p1 }
   0x5   : > { %v457_v0 = vld [vmem:[%s2758_s6] sm:$0xf] (!%p313_p2)  ;;  %vm483_vm0 = vcmask (!%p313_p2), 1043456   ;;  %p371_p3 = scmp.lt.s32.totalorder (!%p313_p2), %s1947_s28, 1  ;;  %v1972_v1 = vld [vmem:[%s2758_s6 + $0x4] sm:$0xf] (!%p313_p2) }
   0x6   : > { %316 = sbr.rel (%p313_p2) target bundleno = 336 (0x150), region = 52  ;;  %2266 = vmatprep.subr.msk.mxu1 (!%p313_p2), %vm483_vm0, %v457_v0  ;;  %2140 = vmatprep.subr.msk.mxu0 (!%p313_p2), %vm483_vm0, %v457_v0  ;;  %v1982_v2 = vld [vmem:[%s2758_s6 + $0x8] sm:$0xf] (!%p313_p2)  ;;  %vm458_vm1 = vcmask (!%p313_p2), 31744   ;;  %v1992_v9 = vld [vmem:[%s2758_s6 + $0xc] sm:$0xf] (!%p313_p2) }
   0x7   : > { %2267 = vmatpush3.msk.msra.mxu1 (!%p313_p2), %vm483_vm0, %v457_v0  ;;  %2141 = vmatpush3.msk.msra.mxu0 (!%p313_p2), %vm483_vm0, %v457_v0  ;;  %v2002_v10 = vld [vmem:[%s2758_s6 + $0x10] sm:$0xf] (!%p313_p2)  ;;  %v2012_v19 = vld [vmem:[%s2758_s6 + $0x14] sm:$0xf] (!%p313_p2)  ;;  %v2022_v20 = vld [vmem:[%s2758_s6 + $0x18] sm:$0xf] (!%p313_p2) }
   0x8   : > { %2154 = vmatprep.subr.msk.mxu1 (!%p313_p2), %vm483_vm0, %v1972_v1  ;;  %2168 = vmatprep.subr.msk.mxu0 (!%p313_p2), %vm483_vm0, %v1982_v2  ;;  %v2032_v37 = vld [vmem:[%s2758_s6 + $0x1c] sm:$0xf] (!%p313_p2)  ;;  %v2042_v38 = vld [vmem:[%s2758_s6 + $0x20] sm:$0xf] (!%p313_p2) }
   0xd   : > { %s2762_s28 = smov (!%p371_p3, %s1947_s28), 1 }
   0xe   : > { %s2268_s13 = smul.u32 72, %s2762_s28  ;;  %s2469_s11 = sshll.u32 %s2762_s28, 6 }
   0xf   : > { %s2491_s28 = scalar_lea.vmem %s2755_s3, %s2469_s11  ;;  %s2497_s17 = scalar_lea.vmem %s2756_s4, %s2469_s11 }
  0x10   : > { %s2359_s16 = scalar_lea.vmem %s2752_s0, %s2268_s13  ;;  %s2383_s19 = scalar_lea.vmem %s2753_s1, %s2268_s13  ;;  %v415_v31 = vld [vmem:[%s2491_s28] sm:$0xff]  ;;  %v416_v33 = vld [vmem:[%s2491_s28 + $0x8] sm:$0xff]  ;;  %v417_v35 = vld [vmem:[%s2491_s28 + $0x10] sm:$0xff] }
  0x11   : > { %v406_v3 = vld [vmem:[%s2359_s16] sm:$0xff]  ;;  %v2366_v5 = vld [vmem:[%s2359_s16 + $0x8] sm:$0xff]  ;;  %v2375_v7 = vld [vmem:[%s2359_s16 + $0x10] sm:$0xff]  ;;  %s2388_s22 = scalar_lea.vmem %s2754_s2, %s2268_s13  ;;  %s2555_s26 = scalar_lea.vmem %s2757_s5, %s2469_s11 }
  0x12   : > { %v2363_v4 = vld [vmem:[%s2359_s16 + $0x20] sm:$0xff]  ;;  %2142 = vmatprep.mubr.msk.f32.mxu0 %vm458_vm1, %v406_v3  ;;  %v2372_v6 = vld [vmem:[%s2359_s16 + $0x28] sm:$0xff]  ;;  %v2378_v8 = vld [vmem:[%s2359_s16 + $0x30] sm:$0xff]  ;;  %s2727_s30 = scalar_lea.vmem %s2760_s8, %s2469_s11 }
  0x13   : > { %2148 = vmatprep.mubr.msk.f32.mxu1 %vm458_vm1, %v2363_v4  ;;  %2143 = vmatmul.mubr.msk.f32.vlgmr.msra.gmra.mrb[0].mxu0 %vm458_vm1, %v2366_v5  ;;  %v2404_v11 = vld [vmem:[%s2359_s16 + $0x18] sm:$0xff]  ;;  %v423_v13 = vld [vmem:[%s2383_s19] sm:$0xff]  ;;  %v2422_v15 = vld [vmem:[%s2383_s19 + $0x8] sm:$0xff] }
  0x14   : > { %2149 = vmatmul.mubr.msk.f32.vlgmr.msra.gmra.mrb[0].mxu1 %vm458_vm1, %v2372_v6  ;;  %2145 = vmatprep.mubr.msk.f32.mxu0 %vm458_vm1, %v2375_v7  ;;  %v2407_v12 = vld [vmem:[%s2359_s16 + $0x38] sm:$0xff]  ;;  %v440_v14 = vld [vmem:[%s2388_s22] sm:$0xff]  ;;  %v2426_v16 = vld [vmem:[%s2388_s22 + $0x8] sm:$0xff] }
  0x15   : > { %2155 = vmatpush3.msk.msra.mxu1 %vm483_vm0, %v1972_v1  ;;  %2151 = vmatprep.mubr.msk.f32.mxu1 %vm458_vm1, %v2378_v8  ;;  %v2429_v17 = vld [vmem:[%s2383_s19 + $0x10] sm:$0xff]  ;;  %v2447_v21 = vld [vmem:[%s2383_s19 + $0x18] sm:$0xff]  ;;  %v2454_v23 = vld [vmem:[%s2383_s19 + $0x20] sm:$0xff] }
  0x16   : > { %2169 = vmatpush3.msk.msra.mxu0 %vm483_vm0, %v1982_v2  ;;  %2182 = vmatprep.subr.msk.mxu1 %vm483_vm0, %v1992_v9  ;;  %v2432_v18 = vld [vmem:[%s2388_s22 + $0x10] sm:$0xff]  ;;  %v2451_v22 = vld [vmem:[%s2388_s22 + $0x18] sm:$0xff]  ;;  %v2460_v24 = vld [vmem:[%s2388_s22 + $0x20] sm:$0xff] }
  0x17   : > { %2196 = vmatprep.subr.msk.mxu0 %vm483_vm0, %v2002_v10  ;;  %2146 = vmatmul.mubr.msk.f32.gmra.mrb[2].mxu0 %vm458_vm1, %v2404_v11  ;;  %v2474_v25 = vld [vmem:[%s2383_s19 + $0x28] sm:$0xff]  ;;  %v2482_v27 = vld [vmem:[%s2383_s19 + $0x30] sm:$0xff]  ;;  %v2506_v29 = vld [vmem:[%s2383_s19 + $0x38] sm:$0xff] }
  0x18   : > { %2152 = vmatmul.mubr.msk.f32.gmra.mrb[2].mxu1 %vm458_vm1, %v2407_v12  ;;  %2170 = vmatprep.mubr.msk.f32.mxu0 %vm458_vm1, %v440_v14  ;;  %v2479_v26 = vld [vmem:[%s2388_s22 + $0x28] sm:$0xff]  ;;  %v2485_v28 = vld [vmem:[%s2388_s22 + $0x30] sm:$0xff]  ;;  %v2511_v30 = vld [vmem:[%s2388_s22 + $0x38] sm:$0xff] }
  0x19   : > { %2156 = vmatprep.mubr.msk.f32.mxu1 %vm458_vm1, %v423_v13  ;;  %v432_v32 = vld [vmem:[%s2497_s17] sm:$0xff]  ;;  %v433_v34 = vld [vmem:[%s2497_s17 + $0x8] sm:$0xff]  ;;  %v434_v36 = vld [vmem:[%s2497_s17 + $0x10] sm:$0xff] }
  0x1a   : > { %v418_v39 = vld [vmem:[%s2491_s28 + $0x18] sm:$0xff]  ;;  %v419_v41 = vld [vmem:[%s2491_s28 + $0x20] sm:$0xff]  ;;  %v420_v43 = vld [vmem:[%s2491_s28 + $0x28] sm:$0xff] }
  0x1b   : > { %2171 = vmatmul.mubr.msk.f32.vlgmr.msra.gmra.mrb[4].mxu0 %vm458_vm1, %v2426_v16  ;;  %v435_v40 = vld [vmem:[%s2497_s17 + $0x18] sm:$0xff]  ;;  %v436_v42 = vld [vmem:[%s2497_s17 + $0x20] sm:$0xff]  ;;  %v437_v44 = vld [vmem:[%s2497_s17 + $0x28] sm:$0xff] }
  0x1c   : > { %2157 = vmatmul.mubr.msk.f32.vlgmr.msra.gmra.mrb[4].mxu1 %vm458_vm1, %v2422_v15  ;;  %2173 = vmatprep.mubr.msk.f32.mxu0 %vm458_vm1, %v2432_v18  ;;  %v421_v45 = vld [vmem:[%s2491_s28 + $0x30] sm:$0xff]  ;;  %v422_v47 = vld [vmem:[%s2491_s28 + $0x38] sm:$0xff]  ;;  %v449_v49 = vld [vmem:[%s2555_s26] sm:$0xff] }
  0x1d   : > { %2159 = vmatprep.mubr.msk.f32.mxu1 %vm458_vm1, %v2429_v17  ;;  %2183 = vmatpush3.msk.msra.mxu1 %vm483_vm0, %v1992_v9  ;;  %v438_v46 = vld [vmem:[%s2497_s17 + $0x30] sm:$0xff]  ;;  %v439_v48 = vld [vmem:[%s2497_s17 + $0x38] sm:$0xff]  ;;  %v450_v50 = vld [vmem:[%s2555_s26 + $0x8] sm:$0xff] }
  0x1e   : > { %2197 = vmatpush3.msk.msra.mxu0 %vm483_vm0, %v2002_v10  ;;  %2210 = vmatprep.subr.msk.mxu1 %vm483_vm0, %v2012_v19  ;;  %v451_v51 = vld [vmem:[%s2555_s26 + $0x10] sm:$0xff]  ;;  %v452_v52 = vld [vmem:[%s2555_s26 + $0x18] sm:$0xff]  ;;  %v453_v53 = vld [vmem:[%s2555_s26 + $0x20] sm:$0xff] }
  0x1f   : > { %2224 = vmatprep.subr.msk.mxu0 %vm483_vm0, %v2022_v20  ;;  %2174 = vmatmul.mubr.msk.f32.gmra.mrb[6].mxu0 %vm458_vm1, %v2451_v22  ;;  %v454_v54 = vld [vmem:[%s2555_s26 + $0x28] sm:$0xff]  ;;  %v455_v55 = vld [vmem:[%s2555_s26 + $0x30] sm:$0xff]  ;;  %v456_v56 = vld [vmem:[%s2555_s26 + $0x38] sm:$0xff] }
  0x20   : > { %2160 = vmatmul.mubr.msk.f32.gmra.mrb[6].mxu1 %vm458_vm1, %v2447_v21  ;;  %2176 = vmatprep.mubr.msk.f32.mxu0 %vm458_vm1, %v2460_v24  ;;  %v414_v57 = vld [vmem:[%s2359_s16 + $0x40] sm:$0xff] }
  0x21   : > { %2162 = vmatprep.mubr.msk.f32.mxu1 %vm458_vm1, %v2454_v23  ;;  %v431_v58 = vld [vmem:[%s2383_s19 + $0x40] sm:$0xff] }
  0x22   : > { %v448_v59 = vld [vmem:[%s2388_s22 + $0x40] sm:$0xff] }
  0x23   : > { %2177 = vmatmul.mubr.msk.f32.gmra.mrb[8].mxu0 %vm458_vm1, %v2479_v26 }
  0x24   : > { %2163 = vmatmul.mubr.msk.f32.gmra.mrb[8].mxu1 %vm458_vm1, %v2474_v25  ;;  %2179 = vmatprep.mubr.msk.f32.mxu0 %vm458_vm1, %v2485_v28 }
  0x25   : > { %2165 = vmatprep.mubr.msk.f32.mxu1 %vm458_vm1, %v2482_v27 }
  0x27   : > { %2180 = vmatmul.mubr.msk.f32.gmra.mrb[10].mxu0 %vm458_vm1, %v2511_v30 }
  0x28   : > { %2166 = vmatmul.mubr.msk.f32.gmra.mrb[10].mxu1 %vm458_vm1, %v2506_v29  ;;  %2198 = vmatprep.mubr.msk.f32.mxu0 %vm458_vm1, %v432_v32 }
  0x29   : > { %2184 = vmatprep.mubr.msk.f32.mxu1 %vm458_vm1, %v415_v31 }
  0x2b   : > { %2199 = vmatmul.mubr.msk.f32.vlgmr.msra.gmra.mrb[12].mxu0 %vm458_vm1, %v433_v34 }
  0x2c   : > { %2185 = vmatmul.mubr.msk.f32.vlgmr.msra.gmra.mrb[12].mxu1 %vm458_vm1, %v416_v33  ;;  %2201 = vmatprep.mubr.msk.f32.mxu0 %vm458_vm1, %v434_v36 }
  0x2d   : > { %2187 = vmatprep.mubr.msk.f32.mxu1 %vm458_vm1, %v417_v35  ;;  %2211 = vmatpush3.msk.msra.mxu1 %vm483_vm0, %v2012_v19 }
  0x2e   : > { %2225 = vmatpush3.msk.msra.mxu0 %vm483_vm0, %v2022_v20  ;;  %2238 = vmatprep.subr.msk.mxu1 %vm483_vm0, %v2032_v37 }
  0x2f   : > { %2252 = vmatprep.subr.msk.mxu0 %vm483_vm0, %v2042_v38  ;;  %2202 = vmatmul.mubr.msk.f32.gmra.mrb[14].mxu0 %vm458_vm1, %v435_v40 }
  0x30   : > { %2188 = vmatmul.mubr.msk.f32.gmra.mrb[14].mxu1 %vm458_vm1, %v418_v39  ;;  %2204 = vmatprep.mubr.msk.f32.mxu0 %vm458_vm1, %v436_v42 }
  0x31   : > { %2190 = vmatprep.mubr.msk.f32.mxu1 %vm458_vm1, %v419_v41 }
  0x33   : > { %2205 = vmatmul.mubr.msk.f32.gmra.mrb[16].mxu0 %vm458_vm1, %v437_v44 }
  0x34   : > { %2191 = vmatmul.mubr.msk.f32.gmra.mrb[16].mxu1 %vm458_vm1, %v420_v43  ;;  %2207 = vmatprep.mubr.msk.f32.mxu0 %vm458_vm1, %v438_v46 }
  0x35   : > { %2193 = vmatprep.mubr.msk.f32.mxu1 %vm458_vm1, %v421_v45 }
  0x37   : > { %2208 = vmatmul.mubr.msk.f32.gmra.mrb[18].mxu0 %vm458_vm1, %v439_v48 }
  0x38   : > { %2194 = vmatmul.mubr.msk.f32.gmra.mrb[18].mxu1 %vm458_vm1, %v422_v47  ;;  %2226 = vmatprep.mubr.msk.f32.mxu0 %vm458_vm1, %v2366_v5 }
  0x39   : > { %2212 = vmatprep.mubr.msk.f32.mxu1 %vm458_vm1, %v449_v49 }
  0x3b   : > { %2227 = vmatmul.mubr.msk.f32.vlgmr.msra.gmra.mrb[20].mxu0 %vm458_vm1, %v2375_v7 }
  0x3c   : > { %2213 = vmatmul.mubr.msk.f32.vlgmr.msra.gmra.mrb[20].mxu1 %vm458_vm1, %v450_v50  ;;  %2229 = vmatprep.mubr.msk.f32.mxu0 %vm458_vm1, %v2404_v11 }
  0x3d   : > { %2215 = vmatprep.mubr.msk.f32.mxu1 %vm458_vm1, %v451_v51  ;;  %2239 = vmatpush3.msk.msra.mxu1 %vm483_vm0, %v2032_v37 }
  0x3e   : > { %2253 = vmatpush3.msk.msra.mxu0 %vm483_vm0, %v2042_v38 }
  0x3f   : > { %2230 = vmatmul.mubr.msk.f32.gmra.mrb[22].mxu0 %vm458_vm1, %v2363_v4 }
  0x40   : > { %2216 = vmatmul.mubr.msk.f32.gmra.mrb[22].mxu1 %vm458_vm1, %v452_v52  ;;  %2232 = vmatprep.mubr.msk.f32.mxu0 %vm458_vm1, %v2372_v6 }
  0x41   : > { %2218 = vmatprep.mubr.msk.f32.mxu1 %vm458_vm1, %v453_v53 }
  0x43   : > { %2233 = vmatmul.mubr.msk.f32.gmra.mrb[24].mxu0 %vm458_vm1, %v2378_v8 }
  0x44   : > { %2219 = vmatmul.mubr.msk.f32.gmra.mrb[24].mxu1 %vm458_vm1, %v454_v54  ;;  %2235 = vmatprep.mubr.msk.f32.mxu0 %vm458_vm1, %v2407_v12 }
  0x45   : > { %2221 = vmatprep.mubr.msk.f32.mxu1 %vm458_vm1, %v455_v55 }
  0x47   : > { %2236 = vmatmul.mubr.msk.f32.gmra.mrb[26].mxu0 %vm458_vm1, %v414_v57 }
  0x48   : > { %2222 = vmatmul.mubr.msk.f32.gmra.mrb[26].mxu1 %vm458_vm1, %v456_v56  ;;  %2254 = vmatprep.mubr.msk.f32.mxu0 %vm458_vm1, %v2426_v16 }
  0x49   : > { %2240 = vmatprep.mubr.msk.f32.mxu1 %vm458_vm1, %v2422_v15 }
  0x4b   : > { %2255 = vmatmul.mubr.msk.f32.vlgmr.msra.gmra.mrb[28].mxu0 %vm458_vm1, %v2432_v18 }
  0x4c   : > { %2241 = vmatmul.mubr.msk.f32.vlgmr.msra.gmra.mrb[28].mxu1 %vm458_vm1, %v2429_v17  ;;  %2257 = vmatprep.mubr.msk.f32.mxu0 %vm458_vm1, %v2451_v22 }
  0x4d   : > { %2243 = vmatprep.mubr.msk.f32.mxu1 %vm458_vm1, %v2447_v21 }
  0x4f   : > { %2258 = vmatmul.mubr.msk.f32.gmra.mrb[30].mxu0 %vm458_vm1, %v2460_v24 }
  0x50   : > { %2244 = vmatmul.mubr.msk.f32.gmra.mrb[30].mxu1 %vm458_vm1, %v2454_v23  ;;  %2260 = vmatprep.mubr.msk.f32.mxu0 %vm458_vm1, %v2479_v26 }
  0x51   : > { %2246 = vmatprep.mubr.msk.f32.mxu1 %vm458_vm1, %v2474_v25 }
  0x53   : > { %2261 = vmatmul.mubr.msk.f32.gmra.mrb[32].mxu0 %vm458_vm1, %v2485_v28 }
  0x54   : > { %2247 = vmatmul.mubr.msk.f32.gmra.mrb[32].mxu1 %vm458_vm1, %v2482_v27  ;;  %2263 = vmatprep.mubr.msk.f32.mxu0 %vm458_vm1, %v2511_v30 }
  0x55   : > { %2249 = vmatprep.mubr.msk.f32.mxu1 %vm458_vm1, %v2506_v29 }
  0x57   : > { %2264 = vmatmul.mubr.msk.f32.gmra.mrb[34].mxu0 %vm458_vm1, %v448_v59 }
  0x58   : > { %2250 = vmatmul.mubr.msk.f32.gmra.mrb[34].mxu1 %vm458_vm1, %v431_v58 }
  0xe6   : > { %v2144_v60 = vpop.f32.mrb[0].mxu0 }
  0xe7   : > { %v2150_v61 = vpop.f32.mrb[0].mxu1  ;;  %593 = vst.msk [vmem:[#allocation2 + $0x8] sm:$0xff] %vm458_vm1, %v2144_v60  ;;  %v553_v62 = vpop.f32.mrb[1].mxu0 }
  0xe8   : > { %597 = vst.msk [vmem:[#allocation2 + $0x28] sm:$0xff] %vm458_vm1, %v2150_v61  ;;  %v573_v63 = vpop.f32.mrb[1].mxu1  ;;  %592 = vst.msk [vmem:[#allocation2] sm:$0xff] %vm458_vm1, %v553_v62 }
  0xe9   : > { %596 = vst.msk [vmem:[#allocation2 + $0x20] sm:$0xff] %vm458_vm1, %v573_v63 }
  0xea   : > { %v2147_v0 = vpop.f32.mrb[2].mxu0 }
  0xeb   : > { %v2153_v1 = vpop.f32.mrb[2].mxu1  ;;  %595 = vst.msk [vmem:[#allocation2 + $0x18] sm:$0xff] %vm458_vm1, %v2147_v0  ;;  %v563_v2 = vpop.f32.mrb[3].mxu0 }
  0xec   : > { %599 = vst.msk [vmem:[#allocation2 + $0x38] sm:$0xff] %vm458_vm1, %v2153_v1  ;;  %v583_v3 = vpop.f32.mrb[3].mxu1  ;;  %594 = vst.msk [vmem:[#allocation2 + $0x10] sm:$0xff] %vm458_vm1, %v563_v2 }
  0xed   : > { %598 = vst.msk [vmem:[#allocation2 + $0x30] sm:$0xff] %vm458_vm1, %v583_v3 }
  0xee   : > { %v735_v5 = vld [vmem:[#allocation2 + $0x8] sm:$0xff]  ;;  %v2172_v6 = vpop.f32.mrb[4].mxu0 }
  0xef   : > { %v2158_v4 = vpop.f32.mrb[4].mxu1  ;;  %v734_v9 = vld [vmem:[#allocation2] sm:$0xff]  ;;  %v853_v10 = vpop.f32.mrb[5].mxu0  ;;  %v739_v21 = vld [vmem:[#allocation2 + $0x28] sm:$0xff] }
  0xf0   : > { %v743_v7 = vadd.f32 %v2158_v4, %v735_v5  ;;  %v695_v8 = vpop.f32.mrb[5].mxu1  ;;  %v738_v25 = vld [vmem:[#allocation2 + $0x20] sm:$0xff] }
  0xf1   : > { %v742_v11 = vadd.f32 %v734_v9, %v695_v8 }
  0xf2   : > { %751 = vst.msk [vmem:[#allocation2 + $0x8] sm:$0xff] %vm458_vm1, %v743_v7  ;;  %v737_v13 = vld [vmem:[#allocation2 + $0x18] sm:$0xff]  ;;  %v2175_v14 = vpop.f32.mrb[6].mxu0 }
  0xf3   : > { %750 = vst.msk [vmem:[#allocation2] sm:$0xff] %vm458_vm1, %v742_v11  ;;  %v2161_v12 = vpop.f32.mrb[6].mxu1  ;;  %v736_v17 = vld [vmem:[#allocation2 + $0x10] sm:$0xff]  ;;  %v863_v18 = vpop.f32.mrb[7].mxu0  ;;  %v741_v33 = vld [vmem:[#allocation2 + $0x38] sm:$0xff] }
  0xf4   : > { %v745_v15 = vadd.f32 %v2161_v12, %v737_v13  ;;  %v705_v16 = vpop.f32.mrb[7].mxu1  ;;  %v740_v37 = vld [vmem:[#allocation2 + $0x30] sm:$0xff] }
  0xf5   : > { %v744_v19 = vadd.f32 %v736_v17, %v705_v16 }
  0xf6   : > { %753 = vst.msk [vmem:[#allocation2 + $0x18] sm:$0xff] %vm458_vm1, %v745_v15  ;;  %v2178_v22 = vpop.f32.mrb[8].mxu0 }
  0xf7   : > { %752 = vst.msk [vmem:[#allocation2 + $0x10] sm:$0xff] %vm458_vm1, %v744_v19  ;;  %v2164_v20 = vpop.f32.mrb[8].mxu1  ;;  %v873_v26 = vpop.f32.mrb[9].mxu0 }
  0xf8   : > { %v747_v23 = vadd.f32 %v2164_v20, %v739_v21  ;;  %v715_v24 = vpop.f32.mrb[9].mxu1 }
  0xf9   : > { %v746_v27 = vadd.f32 %v738_v25, %v715_v24  ;;  %v893_v28 = vld [vmem:[#allocation2 + $0x8] sm:$0xff] }
  0xfa   : > { %755 = vst.msk [vmem:[#allocation2 + $0x28] sm:$0xff] %vm458_vm1, %v747_v23  ;;  %v901_v29 = vadd.f32 %v2172_v6, %v893_v28  ;;  %v892_v30 = vld [vmem:[#allocation2] sm:$0xff]  ;;  %v2181_v34 = vpop.f32.mrb[10].mxu0 }
  0xfb   : > { %754 = vst.msk [vmem:[#allocation2 + $0x20] sm:$0xff] %vm458_vm1, %v746_v27  ;;  %v900_v31 = vadd.f32 %v892_v30, %v853_v10  ;;  %v2167_v32 = vpop.f32.mrb[10].mxu1  ;;  %v883_v38 = vpop.f32.mrb[11].mxu0 }
  0xfc   : > { %909 = vst.msk [vmem:[#allocation2 + $0x8] sm:$0xff] %vm458_vm1, %v901_v29  ;;  %v749_v35 = vadd.f32 %v2167_v32, %v741_v33  ;;  %v725_v36 = vpop.f32.mrb[11].mxu1 }
  0xfd   : > { %908 = vst.msk [vmem:[#allocation2] sm:$0xff] %vm458_vm1, %v900_v31  ;;  %v748_v39 = vadd.f32 %v740_v37, %v725_v36  ;;  %v895_v40 = vld [vmem:[#allocation2 + $0x18] sm:$0xff] }
  0xfe   : > { %757 = vst.msk [vmem:[#allocation2 + $0x38] sm:$0xff] %vm458_vm1, %v749_v35  ;;  %v903_v41 = vadd.f32 %v2175_v14, %v895_v40  ;;  %v894_v42 = vld [vmem:[#allocation2 + $0x10] sm:$0xff]  ;;  %v2200_v45 = vpop.f32.mrb[12].mxu0 }
  0xff   : > { %756 = vst.msk [vmem:[#allocation2 + $0x30] sm:$0xff] %vm458_vm1, %v748_v39  ;;  %v902_v43 = vadd.f32 %v894_v42, %v863_v18  ;;  %v2186_v44 = vpop.f32.mrb[12].mxu1  ;;  %v1169_v47 = vpop.f32.mrb[13].mxu0 }
 0x100   : > { %911 = vst.msk [vmem:[#allocation2 + $0x18] sm:$0xff] %vm458_vm1, %v903_v41  ;;  %v1011_v46 = vpop.f32.mrb[13].mxu1 }
 0x101   : > { %910 = vst.msk [vmem:[#allocation2 + $0x10] sm:$0xff] %vm458_vm1, %v902_v43  ;;  %v897_v48 = vld [vmem:[#allocation2 + $0x28] sm:$0xff] }
 0x102   : > { %v905_v49 = vadd.f32 %v2178_v22, %v897_v48  ;;  %v896_v50 = vld [vmem:[#allocation2 + $0x20] sm:$0xff]  ;;  %v2203_v54 = vpop.f32.mrb[14].mxu0 }
 0x103   : > { %v904_v51 = vadd.f32 %v896_v50, %v873_v26  ;;  %v1051_v52 = vld [vmem:[#allocation2 + $0x8] sm:$0xff]  ;;  %v2189_v53 = vpop.f32.mrb[14].mxu1  ;;  %v1179_v58 = vpop.f32.mrb[15].mxu0 }
 0x104   : > { %913 = vst.msk [vmem:[#allocation2 + $0x28] sm:$0xff] %vm458_vm1, %v905_v49  ;;  %v1059_v55 = vadd.f32 %v2186_v44, %v1051_v52  ;;  %v1050_v56 = vld [vmem:[#allocation2] sm:$0xff]  ;;  %v1021_v57 = vpop.f32.mrb[15].mxu1 }
 0x105   : > { %912 = vst.msk [vmem:[#allocation2 + $0x20] sm:$0xff] %vm458_vm1, %v904_v51  ;;  %v1058_v59 = vadd.f32 %v1050_v56, %v1011_v46  ;;  %v899_v60 = vld [vmem:[#allocation2 + $0x38] sm:$0xff] }
 0x106   : > { %1067 = vst.msk [vmem:[#allocation2 + $0x8] sm:$0xff] %vm458_vm1, %v1059_v55  ;;  %v907_v61 = vadd.f32 %v2181_v34, %v899_v60  ;;  %v898_v62 = vld [vmem:[#allocation2 + $0x30] sm:$0xff]  ;;  %v2206_v2 = vpop.f32.mrb[16].mxu0 }
 0x107   : > { %1066 = vst.msk [vmem:[#allocation2] sm:$0xff] %vm458_vm1, %v1058_v59  ;;  %v906_v63 = vadd.f32 %v898_v62, %v883_v38  ;;  %v1053_v0 = vld [vmem:[#allocation2 + $0x18] sm:$0xff]  ;;  %v2192_v1 = vpop.f32.mrb[16].mxu1  ;;  %v1189_v6 = vpop.f32.mrb[17].mxu0 }
 0x108   : > { %915 = vst.msk [vmem:[#allocation2 + $0x38] sm:$0xff] %vm458_vm1, %v907_v61  ;;  %v1061_v3 = vadd.f32 %v2189_v53, %v1053_v0  ;;  %v1052_v4 = vld [vmem:[#allocation2 + $0x10] sm:$0xff]  ;;  %v1031_v5 = vpop.f32.mrb[17].mxu1 }
 0x109   : > { %914 = vst.msk [vmem:[#allocation2 + $0x30] sm:$0xff] %vm458_vm1, %v906_v63  ;;  %v1060_v7 = vadd.f32 %v1052_v4, %v1021_v57 }
 0x10a   : > { %1069 = vst.msk [vmem:[#allocation2 + $0x18] sm:$0xff] %vm458_vm1, %v1061_v3  ;;  %v2209_v10 = vpop.f32.mrb[18].mxu0 }
 0x10b   : > { %1068 = vst.msk [vmem:[#allocation2 + $0x10] sm:$0xff] %vm458_vm1, %v1060_v7  ;;  %v1055_v8 = vld [vmem:[#allocation2 + $0x28] sm:$0xff]  ;;  %v2195_v9 = vpop.f32.mrb[18].mxu1  ;;  %v1199_v14 = vpop.f32.mrb[19].mxu0 }
 0x10c   : > { %v1063_v11 = vadd.f32 %v2192_v1, %v1055_v8  ;;  %v1054_v12 = vld [vmem:[#allocation2 + $0x20] sm:$0xff]  ;;  %v1041_v13 = vpop.f32.mrb[19].mxu1 }
 0x10d   : > { %v1062_v15 = vadd.f32 %v1054_v12, %v1031_v5  ;;  %v1209_v16 = vld [vmem:[#allocation2 + $0x8] sm:$0xff] }
 0x10e   : > { %1071 = vst.msk [vmem:[#allocation2 + $0x28] sm:$0xff] %vm458_vm1, %v1063_v11  ;;  %v1217_v17 = vadd.f32 %v2200_v45, %v1209_v16  ;;  %v1208_v18 = vld [vmem:[#allocation2] sm:$0xff]  ;;  %v2228_v22 = vpop.f32.mrb[20].mxu0 }
 0x10f   : > { %1070 = vst.msk [vmem:[#allocation2 + $0x20] sm:$0xff] %vm458_vm1, %v1062_v15  ;;  %v1216_v19 = vadd.f32 %v1208_v18, %v1169_v47  ;;  %v1057_v20 = vld [vmem:[#allocation2 + $0x38] sm:$0xff]  ;;  %v2214_v21 = vpop.f32.mrb[20].mxu1  ;;  %v1464_v26 = vpop.f32.mrb[21].mxu0 }
 0x110   : > { %1225 = vst.msk [vmem:[#allocation2 + $0x8] sm:$0xff] %vm458_vm1, %v1217_v17  ;;  %v1065_v23 = vadd.f32 %v2195_v9, %v1057_v20  ;;  %v1056_v24 = vld [vmem:[#allocation2 + $0x30] sm:$0xff]  ;;  %v1327_v25 = vpop.f32.mrb[21].mxu1 }
 0x111   : > { %1224 = vst.msk [vmem:[#allocation2] sm:$0xff] %vm458_vm1, %v1216_v19  ;;  %v1064_v27 = vadd.f32 %v1056_v24, %v1041_v13  ;;  %v1211_v28 = vld [vmem:[#allocation2 + $0x18] sm:$0xff] }
 0x112   : > { %1073 = vst.msk [vmem:[#allocation2 + $0x38] sm:$0xff] %vm458_vm1, %v1065_v23  ;;  %v1219_v29 = vadd.f32 %v2203_v54, %v1211_v28  ;;  %v1210_v30 = vld [vmem:[#allocation2 + $0x10] sm:$0xff]  ;;  %v2665_v33 = vpop.f32.mrb[22].mxu0 }
 0x113   : > { %1072 = vst.msk [vmem:[#allocation2 + $0x30] sm:$0xff] %vm458_vm1, %v1064_v27  ;;  %v1218_v31 = vadd.f32 %v1210_v30, %v1179_v58  ;;  %v2217_v32 = vpop.f32.mrb[22].mxu1  ;;  %v2668_v35 = vpop.f32.mrb[23].mxu0 }
 0x114   : > { %1227 = vst.msk [vmem:[#allocation2 + $0x18] sm:$0xff] %vm458_vm1, %v1219_v29  ;;  %v1337_v34 = vpop.f32.mrb[23].mxu1 }
 0x115   : > { %1226 = vst.msk [vmem:[#allocation2 + $0x10] sm:$0xff] %vm458_vm1, %v1218_v31  ;;  %v1213_v36 = vld [vmem:[#allocation2 + $0x28] sm:$0xff] }
 0x116   : > { %v1221_v37 = vadd.f32 %v2206_v2, %v1213_v36  ;;  %v1212_v38 = vld [vmem:[#allocation2 + $0x20] sm:$0xff]  ;;  %v2671_v42 = vpop.f32.mrb[24].mxu0 }
 0x117   : > { %v1220_v39 = vadd.f32 %v1212_v38, %v1189_v6  ;;  %v1367_v40 = vld [vmem:[#allocation2 + $0x8] sm:$0xff]  ;;  %v2220_v41 = vpop.f32.mrb[24].mxu1  ;;  %v1484_v46 = vpop.f32.mrb[25].mxu0 }
 0x118   : > { %1229 = vst.msk [vmem:[#allocation2 + $0x28] sm:$0xff] %vm458_vm1, %v1221_v37  ;;  %v1375_v43 = vadd.f32 %v2214_v21, %v1367_v40  ;;  %v1366_v44 = vld [vmem:[#allocation2] sm:$0xff]  ;;  %v1347_v45 = vpop.f32.mrb[25].mxu1 }
 0x119   : > { %1228 = vst.msk [vmem:[#allocation2 + $0x20] sm:$0xff] %vm458_vm1, %v1220_v39  ;;  %v1374_v47 = vadd.f32 %v1366_v44, %v1327_v25  ;;  %v1215_v48 = vld [vmem:[#allocation2 + $0x38] sm:$0xff] }
 0x11a   : > { %1383 = vst.msk [vmem:[#allocation2 + $0x8] sm:$0xff] %vm458_vm1, %v1375_v43  ;;  %v1223_v49 = vadd.f32 %v2209_v10, %v1215_v48  ;;  %v1214_v50 = vld [vmem:[#allocation2 + $0x30] sm:$0xff]  ;;  %v2237_v54 = vpop.f32.mrb[26].mxu0 }
 0x11b   : > { %1382 = vst.msk [vmem:[#allocation2] sm:$0xff] %vm458_vm1, %v1374_v47  ;;  %v1222_v51 = vadd.f32 %v1214_v50, %v1199_v14  ;;  %v1369_v52 = vld [vmem:[#allocation2 + $0x18] sm:$0xff]  ;;  %v2223_v53 = vpop.f32.mrb[26].mxu1  ;;  %v1494_v58 = vpop.f32.mrb[27].mxu0 }
 0x11c   : > { %1231 = vst.msk [vmem:[#allocation2 + $0x38] sm:$0xff] %vm458_vm1, %v1223_v49  ;;  %v1377_v55 = vadd.f32 %v2217_v32, %v1369_v52  ;;  %v1368_v56 = vld [vmem:[#allocation2 + $0x10] sm:$0xff]  ;;  %v1357_v57 = vpop.f32.mrb[27].mxu1 }
 0x11d   : > { %1230 = vst.msk [vmem:[#allocation2 + $0x30] sm:$0xff] %vm458_vm1, %v1222_v51  ;;  %v1376_v59 = vadd.f32 %v1368_v56, %v1337_v34 }
 0x11e   : > { %1385 = vst.msk [vmem:[#allocation2 + $0x18] sm:$0xff] %vm458_vm1, %v1377_v55  ;;  %v2681_v62 = vpop.f32.mrb[28].mxu0 }
 0x11f   : > { %1384 = vst.msk [vmem:[#allocation2 + $0x10] sm:$0xff] %vm458_vm1, %v1376_v59  ;;  %v1371_v60 = vld [vmem:[#allocation2 + $0x28] sm:$0xff]  ;;  %v2242_v61 = vpop.f32.mrb[28].mxu1  ;;  %v2683_v2 = vpop.f32.mrb[29].mxu0 }
 0x120   : > { %v1379_v63 = vadd.f32 %v2220_v41, %v1371_v60  ;;  %v1370_v0 = vld [vmem:[#allocation2 + $0x20] sm:$0xff]  ;;  %v1601_v1 = vpop.f32.mrb[29].mxu1 }
 0x121   : > { %v1378_v3 = vadd.f32 %v1370_v0, %v1347_v45  ;;  %v1504_v4 = vld [vmem:[#allocation2 + $0x8] sm:$0xff]  ;;  %v2052_v60 = vld [vmem:[%s2759_s7] ss:$0 sm:$0xff] }
 0x122   : > { %1387 = vst.msk [vmem:[#allocation2 + $0x28] sm:$0xff] %vm458_vm1, %v1379_v63  ;;  %v1512_v5 = vadd.f32 %v2228_v22, %v1504_v4  ;;  %v1503_v6 = vld [vmem:[#allocation2] sm:$0xff]  ;;  %v2687_v10 = vpop.f32.mrb[30].mxu0 }
 0x123   : > { %1386 = vst.msk [vmem:[#allocation2 + $0x20] sm:$0xff] %vm458_vm1, %v1378_v3  ;;  %v1511_v7 = vadd.f32 %v1503_v6, %v1464_v26  ;;  %v1373_v8 = vld [vmem:[#allocation2 + $0x38] sm:$0xff]  ;;  %v2245_v9 = vpop.f32.mrb[30].mxu1  ;;  %v2690_v14 = vpop.f32.mrb[31].mxu0 }
 0x124   : > { %1520 = vst.msk [vmem:[#allocation2 + $0x8] sm:$0xff] %vm458_vm1, %v1512_v5  ;;  %v1381_v11 = vadd.f32 %v2223_v53, %v1373_v8  ;;  %v1372_v12 = vld [vmem:[#allocation2 + $0x30] sm:$0xff]  ;;  %v1611_v13 = vpop.f32.mrb[31].mxu1 }
 0x125   : > { %1519 = vst.msk [vmem:[#allocation2] sm:$0xff] %vm458_vm1, %v1511_v7  ;;  %v1380_v15 = vadd.f32 %v1372_v12, %v1357_v57  ;;  %v1506_v16 = vld [vmem:[#allocation2 + $0x18] sm:$0xff] }
 0x126   : > { %1389 = vst.msk [vmem:[#allocation2 + $0x38] sm:$0xff] %vm458_vm1, %v1381_v11  ;;  %v1514_v17 = vadd.f32 %v2665_v33, %v1506_v16  ;;  %v1505_v18 = vld [vmem:[#allocation2 + $0x10] sm:$0xff]  ;;  %v2262_v21 = vpop.f32.mrb[32].mxu0 }
 0x127   : > { %1388 = vst.msk [vmem:[#allocation2 + $0x30] sm:$0xff] %vm458_vm1, %v1380_v15  ;;  %v1513_v19 = vadd.f32 %v1505_v18, %v2668_v35  ;;  %v2248_v20 = vpop.f32.mrb[32].mxu1  ;;  %v1758_v23 = vpop.f32.mrb[33].mxu0 }
 0x128   : > { %1522 = vst.msk [vmem:[#allocation2 + $0x18] sm:$0xff] %vm458_vm1, %v1514_v17  ;;  %v1621_v22 = vpop.f32.mrb[33].mxu1 }
 0x129   : > { %1521 = vst.msk [vmem:[#allocation2 + $0x10] sm:$0xff] %vm458_vm1, %v1513_v19  ;;  %v1508_v24 = vld [vmem:[#allocation2 + $0x28] sm:$0xff] }
 0x12a   : > { %v1516_v25 = vadd.f32 %v2671_v42, %v1508_v24  ;;  %v1507_v26 = vld [vmem:[#allocation2 + $0x20] sm:$0xff]  ;;  %v2265_v30 = vpop.f32.mrb[34].mxu0 }
 0x12b   : > { %v1515_v27 = vadd.f32 %v1507_v26, %v1484_v46  ;;  %v1641_v28 = vld [vmem:[#allocation2 + $0x8] sm:$0xff]  ;;  %v2251_v29 = vpop.f32.mrb[34].mxu1  ;;  %v1768_v34 = vpop.f32.mrb[35].mxu0 }
 0x12c   : > { %1524 = vst.msk [vmem:[#allocation2 + $0x28] sm:$0xff] %vm458_vm1, %v1516_v25  ;;  %v1649_v31 = vadd.f32 %v2242_v61, %v1641_v28  ;;  %v1640_v32 = vld [vmem:[#allocation2] sm:$0xff]  ;;  %v1631_v33 = vpop.f32.mrb[35].mxu1 }
 0x12d   : > { %1523 = vst.msk [vmem:[#allocation2 + $0x20] sm:$0xff] %vm458_vm1, %v1515_v27  ;;  %v1648_v35 = vadd.f32 %v1640_v32, %v1601_v1  ;;  %v1510_v36 = vld [vmem:[#allocation2 + $0x38] sm:$0xff] }
 0x12e   : > { %1657 = vst.msk [vmem:[#allocation2 + $0x8] sm:$0xff] %vm458_vm1, %v1649_v31  ;;  %v1518_v37 = vadd.f32 %v2237_v54, %v1510_v36  ;;  %v1509_v38 = vld [vmem:[#allocation2 + $0x30] sm:$0xff] }
 0x12f   : > { %1656 = vst.msk [vmem:[#allocation2] sm:$0xff] %vm458_vm1, %v1648_v35  ;;  %v1517_v39 = vadd.f32 %v1509_v38, %v1494_v58  ;;  %v1643_v40 = vld [vmem:[#allocation2 + $0x18] sm:$0xff] }
 0x130   : > { %1526 = vst.msk [vmem:[#allocation2 + $0x38] sm:$0xff] %vm458_vm1, %v1518_v37  ;;  %v1651_v41 = vadd.f32 %v2245_v9, %v1643_v40  ;;  %v1642_v42 = vld [vmem:[#allocation2 + $0x10] sm:$0xff] }
 0x131   : > { %1525 = vst.msk [vmem:[#allocation2 + $0x30] sm:$0xff] %vm458_vm1, %v1517_v39  ;;  %v1650_v43 = vadd.f32 %v1642_v42, %v1611_v13 }
 0x132   : > { %1659 = vst.msk [vmem:[#allocation2 + $0x18] sm:$0xff] %vm458_vm1, %v1651_v41 }
 0x133   : > { %1658 = vst.msk [vmem:[#allocation2 + $0x10] sm:$0xff] %vm458_vm1, %v1650_v43  ;;  %v1645_v44 = vld [vmem:[#allocation2 + $0x28] sm:$0xff] }
 0x134   : > { %v1653_v45 = vadd.f32 %v2248_v20, %v1645_v44  ;;  %v1644_v46 = vld [vmem:[#allocation2 + $0x20] sm:$0xff] }
 0x135   : > { %v1652_v47 = vadd.f32 %v1644_v46, %v1621_v22  ;;  %v1778_v48 = vld [vmem:[#allocation2 + $0x8] sm:$0xff] }
 0x136   : > { %1661 = vst.msk [vmem:[#allocation2 + $0x28] sm:$0xff] %vm458_vm1, %v1653_v45  ;;  %v1786_v49 = vadd.f32 %v2681_v62, %v1778_v48  ;;  %v1777_v50 = vld [vmem:[#allocation2] sm:$0xff] }
 0x137   : > { %1660 = vst.msk [vmem:[#allocation2 + $0x20] sm:$0xff] %vm458_vm1, %v1652_v47  ;;  %v1785_v51 = vadd.f32 %v1777_v50, %v2683_v2  ;;  %v1647_v52 = vld [vmem:[#allocation2 + $0x38] sm:$0xff] }
 0x138   : > { %1794 = vst.msk [vmem:[#allocation2 + $0x8] sm:$0xff] %vm458_vm1, %v1786_v49  ;;  %v1655_v53 = vadd.f32 %v2251_v29, %v1647_v52  ;;  %v1646_v54 = vld [vmem:[#allocation2 + $0x30] sm:$0xff] }
 0x139   : > { %1793 = vst.msk [vmem:[#allocation2] sm:$0xff] %vm458_vm1, %v1785_v51  ;;  %v1654_v55 = vadd.f32 %v1646_v54, %v1631_v33  ;;  %v1780_v56 = vld [vmem:[#allocation2 + $0x18] sm:$0xff] }
 0x13a   : > { %1663 = vst.msk [vmem:[#allocation2 + $0x38] sm:$0xff] %vm458_vm1, %v1655_v53  ;;  %v1788_v57 = vadd.f32 %v2687_v10, %v1780_v56  ;;  %v1779_v58 = vld [vmem:[#allocation2 + $0x10] sm:$0xff] }
 0x13b   : > { %1662 = vst.msk [vmem:[#allocation2 + $0x30] sm:$0xff] %vm458_vm1, %v1654_v55  ;;  %v1787_v59 = vadd.f32 %v1779_v58, %v2690_v14 }
 0x13c   : > { %1796 = vst.msk [vmem:[#allocation2 + $0x18] sm:$0xff] %vm458_vm1, %v1788_v57 }
 0x13d   : > { %1795 = vst.msk [vmem:[#allocation2 + $0x10] sm:$0xff] %vm458_vm1, %v1787_v59  ;;  %v1782_v61 = vld [vmem:[#allocation2 + $0x28] sm:$0xff] }
 0x13e   : > { %v1790_v62 = vadd.f32 %v2262_v21, %v1782_v61  ;;  %v1781_v63 = vld [vmem:[#allocation2 + $0x20] sm:$0xff] }
 0x13f   : > { %v1802_v0 = vld [vmem:[#allocation2 + $0x8] sm:$0xff]  ;;  %v1789_v1 = vadd.f32 %v1781_v63, %v1758_v23 }
 0x140   : > { %v1817_v2 = vadd.f32 %v2052_v60, %v1802_v0  ;;  %v1801_v3 = vld [vmem:[#allocation2] sm:$0xff]  ;;  %1798 = vst.msk [vmem:[#allocation2 + $0x28] sm:$0xff] %vm458_vm1, %v1790_v62 }
 0x141   : > { %v1816_v4 = vadd.f32 %v2052_v60, %v1801_v3  ;;  %1797 = vst.msk [vmem:[#allocation2 + $0x20] sm:$0xff] %vm458_vm1, %v1789_v1  ;;  %v1784_v5 = vld [vmem:[#allocation2 + $0x38] sm:$0xff] }
 0x142   : > { %1825 = vst.msk [vmem:[%s2727_s30 + $0x8] sm:$0xff] %vm458_vm1, %v1817_v2  ;;  %v1792_v6 = vadd.f32 %v2265_v30, %v1784_v5  ;;  %v1783_v7 = vld [vmem:[#allocation2 + $0x30] sm:$0xff] }
 0x143   : > { %1824 = vst.msk [vmem:[%s2727_s30] sm:$0xff] %vm458_vm1, %v1816_v4  ;;  %v1804_v8 = vld [vmem:[#allocation2 + $0x18] sm:$0xff]  ;;  %v1791_v9 = vadd.f32 %v1783_v7, %v1768_v34 }
 0x144   : > { %v1819_v10 = vadd.f32 %v2052_v60, %v1804_v8  ;;  %v1803_v11 = vld [vmem:[#allocation2 + $0x10] sm:$0xff]  ;;  %1800 = vst.msk [vmem:[#allocation2 + $0x38] sm:$0xff] %vm458_vm1, %v1792_v6 }
 0x145   : > { %v1818_v12 = vadd.f32 %v2052_v60, %v1803_v11  ;;  %1799 = vst.msk [vmem:[#allocation2 + $0x30] sm:$0xff] %vm458_vm1, %v1791_v9 }
 0x146   : > { %1827 = vst.msk [vmem:[%s2727_s30 + $0x18] sm:$0xff] %vm458_vm1, %v1819_v10 }
 0x147   : > { %1826 = vst.msk [vmem:[%s2727_s30 + $0x10] sm:$0xff] %vm458_vm1, %v1818_v12  ;;  %v1806_v13 = vld [vmem:[#allocation2 + $0x28] sm:$0xff] }
 0x148   : > { %v1821_v14 = vadd.f32 %v2052_v60, %v1806_v13  ;;  %v1805_v15 = vld [vmem:[#allocation2 + $0x20] sm:$0xff] }
 0x149   : > { %v1820_v16 = vadd.f32 %v2052_v60, %v1805_v15 }
 0x14a   : > { %1829 = vst.msk [vmem:[%s2727_s30 + $0x28] sm:$0xff] %vm458_vm1, %v1821_v14 }
 0x14b   : > { %1828 = vst.msk [vmem:[%s2727_s30 + $0x20] sm:$0xff] %vm458_vm1, %v1820_v16  ;;  %v1808_v17 = vld [vmem:[#allocation2 + $0x38] sm:$0xff] }
 0x14c   : > { %v1823_v18 = vadd.f32 %v2052_v60, %v1808_v17  ;;  %v1807_v19 = vld [vmem:[#allocation2 + $0x30] sm:$0xff] }
 0x14d   : > { %v1822_v20 = vadd.f32 %v2052_v60, %v1807_v19 }
 0x14e   : > { %1831 = vst.msk [vmem:[%s2727_s30 + $0x38] sm:$0xff] %vm458_vm1, %v1823_v18 }
 0x14f   : > { %1830 = vst.msk [vmem:[%s2727_s30 + $0x30] sm:$0xff] %vm458_vm1, %v1822_v20 }
 0x150 PF: > { %s18_s27 = sadd.s32 1, %s2283_s27  }
 0x151   : > { %p15_p4 = scmp.ge.s32.totalorder %s18_s27, 4  }
 0x153   :  { %17 = sbr.rel (!%p15_p4) target bundleno = 1 (0x1), region = 105 }

// kernel: _lambda_.3
= control target key start
LH: loop header
LB: loop body
LE: loop exit
PB: predicated region body
PF: predicated region fallthrough
CT: control target
= control target key end

     0   :  { %s1593_s27 = smov 0   ;;  %s1728_s0 = inlined_call_operand.vmem [shape: f32[2,20,4], index: 0, kind: input, shape index: {}]   ;;  %s1729_s1 = inlined_call_operand.vmem [shape: f32[2,20,4], index: 1, kind: input, shape index: {}]   ;;  %s1730_s2 = inlined_call_operand.vmem [shape: f32[2,20,4], index: 2, kind: input, shape index: {}]   ;;  %s1731_s3 = inlined_call_operand.vmem [shape: f32[2,16,4], index: 3, kind: input, shape index: {}]   ;;  %s1732_s4 = inlined_call_operand.vmem [shape: f32[2,16,4], index: 4, kind: input, shape index: {}]   ;;  %s1733_s5 = inlined_call_operand.vmem [shape: f32[2,16,4], index: 5, kind: input, shape index: {}]   ;;  %s1734_s6 = inlined_call_operand.vmem [shape: f32[9,4,4], index: 6, kind: input, shape index: {}]   ;;  %s1735_s7 = inlined_call_operand.vmem [shape: f32[1,4], index: 7, kind: input, shape index: {}]   ;;  %s1736_s8 = inlined_call_operand.vmem [shape: f32[2,16,4], index: 8, kind: output, shape index: {}]  }
   0x1 LB: > { %s1401_s28 = sadd.s32 4294967295, %s1546_s27   ;;  %p1405_p0 = scmp.ge.s32.totalorder %s1546_s27, 1  ;;  %s1546_s27 = sphi %s1593_s27, %s18_s27  }
   0x2   : > { %p312_p1 = scmp.lt.s32.totalorder %s1546_s27, 3 }
   0x4   : > { %p313_p2 = pnand %p1405_p0, %p312_p1 }
   0x5   : > { %v436_v0 = vld [vmem:[%s1734_s6] sm:$0xf] (!%p313_p2)  ;;  %vm444_vm0 = vcmask (!%p313_p2), 1043456   ;;  %p371_p3 = scmp.lt.s32.totalorder (!%p313_p2), %s1401_s28, 1  ;;  %v1420_v1 = vld [vmem:[%s1734_s6 + $0x4] sm:$0xf] (!%p313_p2) }
   0x6   : > { %316 = sbr.rel (%p313_p2) target bundleno = 325 (0x145), region = 52  ;;  %1486 = vmatprep.subr.msk.mxu0 (!%p313_p2), %vm444_vm0, %v436_v0  ;;  %v1424_v2 = vld [vmem:[%s1734_s6 + $0x8] sm:$0xf] (!%p313_p2)  ;;  %v1428_v3 = vld [vmem:[%s1734_s6 + $0xc] sm:$0xf] (!%p313_p2)  ;;  %1491 = vmatprep.subr.msk.mxu1 (!%p313_p2), %vm444_vm0, %v1420_v1  ;;  %vm437_vm1 = vcmask (!%p313_p2), 31744  }
   0x7   : > { %1487 = vmatpush3.msk.msra.mxu0 (!%p313_p2), %vm444_vm0, %v436_v0  ;;  %1492 = vmatpush3.msk.msra.mxu1 (!%p313_p2), %vm444_vm0, %v1420_v1  ;;  %v1432_v22 = vld [vmem:[%s1734_s6 + $0x10] sm:$0xf] (!%p313_p2)  ;;  %v1436_v27 = vld [vmem:[%s1734_s6 + $0x14] sm:$0xf] (!%p313_p2)  ;;  %v1440_v37 = vld [vmem:[%s1734_s6 + $0x18] sm:$0xf] (!%p313_p2) }
   0x8   : > { %1496 = vmatprep.subr.msk.mxu0 (!%p313_p2), %vm444_vm0, %v1424_v2  ;;  %1501 = vmatprep.subr.msk.mxu1 (!%p313_p2), %vm444_vm0, %v1428_v3  ;;  %v1444_v41 = vld [vmem:[%s1734_s6 + $0x1c] sm:$0xf] (!%p313_p2)  ;;  %v1448_v48 = vld [vmem:[%s1734_s6 + $0x20] sm:$0xf] (!%p313_p2) }
   0xd   : > { %s1738_s28 = smov (!%p371_p3, %s1401_s28), 1 }
   0xe   : > { %s1531_s15 = smul.u32 24, %s1738_s28  ;;  %s1618_s16 = sshll.u32 %s1738_s28, 4 }
   0xf   : > { %s390_s19 = scalar_lea.vmem %s1731_s3, %s1618_s16  ;;  %s395_s10 = scalar_lea.vmem %s1732_s4, %s1618_s16 }
  0x10   : > { %s375_s22 = scalar_lea.vmem %s1728_s0, %s1531_s15  ;;  %s380_s25 = scalar_lea.vmem %s1729_s1, %s1531_s15  ;;  %v409_v4 = vld [vmem:[%s390_s19] sm:$0xff]  ;;  %v410_v7 = vld [vmem:[%s390_s19 + $0x8] sm:$0xff] }
  0x11   : > { %v406_v5 = vld [vmem:[%s375_s22] sm:$0xff]  ;;  %v407_v6 = vld [vmem:[%s375_s22 + $0x8] sm:$0xff]  ;;  %s1634_s29 = scalar_lea.vmem %s1730_s2, %s1531_s15  ;;  %s400_s13 = scalar_lea.vmem %s1733_s5, %s1618_s16  ;;  %v408_v13 = vld [vmem:[%s375_s22 + $0x10] sm:$0xf]  ;;  %v414_v19 = vmax.f32 %v409_v4, 0.0  ;;  %v415_v25 = vmax.f32 %v410_v7, 0.0 }
  0x12   : > { %v411_v8 = vmax.f32 %v406_v5, 0.0  ;;  %v412_v9 = vmax.f32 %v407_v6, 0.0  ;;  %v416_v10 = vld [vmem:[%s380_s25] sm:$0xff]  ;;  %v417_v11 = vld [vmem:[%s380_s25 + $0x8] sm:$0xff]  ;;  %v418_v18 = vld [vmem:[%s380_s25 + $0x10] sm:$0xf]  ;;  %s405_s30 = scalar_lea.vmem %s1736_s8, %s1618_s16 }
  0x13   : > { %v426_v12 = vld [vmem:[%s1634_s29] sm:$0xff]  ;;  %v421_v14 = vmax.f32 %v416_v10, 0.0  ;;  %v422_v15 = vmax.f32 %v417_v11, 0.0  ;;  %v427_v17 = vld [vmem:[%s1634_s29 + $0x8] sm:$0xff]  ;;  %v413_v24 = vmax.f32 %v408_v13, 0.0  ;;  %v423_v28 = vmax.f32 %v418_v18, 0.0 }
  0x14   : > { %v431_v16 = vmax.f32 %v426_v12, 0.0  ;;  %1488 = vmatprep.mubr.msk.f32.mxu0 %vm437_vm1, %v411_v8  ;;  %v419_v20 = vld [vmem:[%s395_s10] sm:$0xff]  ;;  %v432_v21 = vmax.f32 %v427_v17, 0.0  ;;  %v420_v26 = vld [vmem:[%s395_s10 + $0x8] sm:$0xff]  ;;  %v428_v31 = vld [vmem:[%s1634_s29 + $0x10] sm:$0xf] }
  0x15   : > { %1489 = vmatmul.mubr.msk.f32.vlgmr.msra.gmra.mrb[0].mxu0 %vm437_vm1, %v412_v9  ;;  %1493 = vmatprep.mubr.msk.f32.mxu1 %vm437_vm1, %v421_v14  ;;  %v429_v23 = vld [vmem:[%s400_s13] sm:$0xff]  ;;  %v424_v29 = vmax.f32 %v419_v20, 0.0  ;;  %v430_v30 = vld [vmem:[%s400_s13 + $0x8] sm:$0xff]  ;;  %v988_v32 = vrot.slane %v411_v8, 4  ;;  %v989_v34 = vrot.slane %v412_v9, 4  ;;  %v1084_v35 = vrot.slane %v421_v14, 4 }
  0x16   : > { %1494 = vmatmul.mubr.msk.f32.vlgmr.msra.gmra.mrb[0].mxu1 %vm437_vm1, %v422_v15  ;;  %1497 = vmatpush3.msk.msra.mxu0 %vm444_vm0, %v1424_v2  ;;  %v434_v33 = vmax.f32 %v429_v23, 0.0  ;;  %v425_v36 = vmax.f32 %v420_v26, 0.0  ;;  %v1085_v38 = vrot.slane %v422_v15, 4  ;;  %v991_v39 = vrot.slane %v413_v24, 4 }
  0x17   : > { %1498 = vmatprep.mubr.msk.f32.mxu0 %vm437_vm1, %v431_v16  ;;  %1502 = vmatpush3.msk.msra.mxu1 %vm444_vm0, %v1428_v3  ;;  %v435_v40 = vmax.f32 %v430_v30, 0.0  ;;  %v433_v42 = vmax.f32 %v428_v31, 0.0  ;;  %v1087_v43 = vrot.slane %v423_v28, 4  ;;  %v990_v44 = vsel %vm444_vm0, %v988_v32, %v989_v34 }
  0x18   : > { %1503 = vmatprep.mubr.msk.f32.mxu1 %vm437_vm1, %v414_v19  ;;  %1506 = vmatprep.subr.msk.mxu0 %vm444_vm0, %v1432_v22  ;;  %v1180_v45 = vrot.slane %v431_v16, 4  ;;  %v1181_v46 = vrot.slane %v432_v21, 4  ;;  %v1086_v47 = vsel %vm444_vm0, %v1084_v35, %v1085_v38  ;;  %v992_v49 = vsel %vm444_vm0, %v989_v34, %v991_v39 }
  0x19   : > { %1499 = vmatmul.mubr.msk.f32.vlgmr.msra.gmra.mrb[2].mxu0 %vm437_vm1, %v432_v21  ;;  %1511 = vmatprep.subr.msk.mxu1 %vm444_vm0, %v1436_v27  ;;  %v1183_v50 = vrot.slane %v433_v42, 4  ;;  %v1088_v51 = vsel %vm444_vm0, %v1085_v38, %v1087_v43 }
  0x1a   : > { %1504 = vmatmul.mubr.msk.f32.vlgmr.msra.gmra.mrb[2].mxu1 %vm437_vm1, %v415_v25  ;;  %1507 = vmatpush3.msk.msra.mxu0 %vm444_vm0, %v1432_v22  ;;  %v1182_v52 = vsel %vm444_vm0, %v1180_v45, %v1181_v46 }
  0x1b   : > { %1508 = vmatprep.mubr.msk.f32.mxu0 %vm437_vm1, %v424_v29  ;;  %1512 = vmatpush3.msk.msra.mxu1 %vm444_vm0, %v1436_v27  ;;  %v1184_v53 = vsel %vm444_vm0, %v1181_v46, %v1183_v50 }
  0x1c   : > { %1513 = vmatprep.mubr.msk.f32.mxu1 %vm437_vm1, %v434_v33  ;;  %1516 = vmatprep.subr.msk.mxu0 %vm444_vm0, %v1440_v37 }
  0x1d   : > { %1509 = vmatmul.mubr.msk.f32.vlgmr.msra.gmra.mrb[4].mxu0 %vm437_vm1, %v425_v36  ;;  %1521 = vmatprep.subr.msk.mxu1 %vm444_vm0, %v1444_v41 }
  0x1e   : > { %1514 = vmatmul.mubr.msk.f32.vlgmr.msra.gmra.mrb[4].mxu1 %vm437_vm1, %v435_v40  ;;  %1517 = vmatpush3.msk.msra.mxu0 %vm444_vm0, %v1440_v37  ;;  %v1452_v40 = vld [vmem:[%s1735_s7] ss:$0 sm:$0xff] }
  0x1f   : > { %1518 = vmatprep.mubr.msk.f32.mxu0 %vm437_vm1, %v990_v44  ;;  %1522 = vmatpush3.msk.msra.mxu1 %vm444_vm0, %v1444_v41 }
  0x20   : > { %1523 = vmatprep.mubr.msk.f32.mxu1 %vm437_vm1, %v1086_v47  ;;  %1526 = vmatprep.subr.msk.mxu0 %vm444_vm0, %v1448_v48 }
  0x21   : > { %1519 = vmatmul.mubr.msk.f32.vlgmr.msra.gmra.mrb[6].mxu0 %vm437_vm1, %v992_v49 }
  0x22   : > { %1524 = vmatmul.mubr.msk.f32.vlgmr.msra.gmra.mrb[6].mxu1 %vm437_vm1, %v1088_v51  ;;  %1527 = vmatpush3.msk.msra.mxu0 %vm444_vm0, %v1448_v48 }
  0x23   : > { %1528 = vmatprep.mubr.msk.f32.mxu0 %vm437_vm1, %v1182_v52 }
  0x25   : > { %1529 = vmatmul.mubr.msk.f32.vlgmr.msra.gmra.mrb[8].mxu0 %vm437_vm1, %v1184_v53 }
  0xe8   : > { %v1490_v54 = vpop.f32.mrb[0].mxu0 }
  0xe9   : > { %524 = vst.msk [vmem:[#allocation2 + $0x8] sm:$0xff] %vm437_vm1, %v1490_v54  ;;  %v514_v55 = vpop.f32.mrb[1].mxu0  ;;  %v1495_v56 = vpop.f32.mrb[0].mxu1 }
  0xea   : > { %523 = vst.msk [vmem:[#allocation2] sm:$0xff] %vm437_vm1, %v514_v55  ;;  %v602_v57 = vpop.f32.mrb[1].mxu1 }
  0xec   : > { %v1500_v58 = vpop.f32.mrb[2].mxu0 }
  0xed   : > { %v694_v59 = vpop.f32.mrb[3].mxu0  ;;  %v1505_v60 = vpop.f32.mrb[2].mxu1 }
  0xee   : > { %v786_v61 = vpop.f32.mrb[3].mxu1 }
  0xf0   : > { %v612_v62 = vld [vmem:[#allocation2 + $0x8] sm:$0xff]  ;;  %v1510_v63 = vpop.f32.mrb[4].mxu0 }
  0xf1   : > { %v614_v0 = vadd.f32 %v1495_v56, %v612_v62  ;;  %v611_v1 = vld [vmem:[#allocation2] sm:$0xff]  ;;  %v878_v2 = vpop.f32.mrb[5].mxu0  ;;  %v1515_v3 = vpop.f32.mrb[4].mxu1 }
  0xf2   : > { %v613_v4 = vadd.f32 %v611_v1, %v602_v57  ;;  %v970_v5 = vpop.f32.mrb[5].mxu1 }
  0xf3   : > { %616 = vst.msk [vmem:[#allocation2 + $0x8] sm:$0xff] %vm437_vm1, %v614_v0 }
  0xf4   : > { %615 = vst.msk [vmem:[#allocation2] sm:$0xff] %vm437_vm1, %v613_v4  ;;  %v1520_v6 = vpop.f32.mrb[6].mxu0 }
  0xf5   : > { %v1066_v7 = vpop.f32.mrb[7].mxu0  ;;  %v1525_v8 = vpop.f32.mrb[6].mxu1 }
  0xf6   : > { %v1162_v9 = vpop.f32.mrb[7].mxu1 }
  0xf8   : > { %v1530_v10 = vpop.f32.mrb[8].mxu0 }
  0xf9   : > { %v1258_v11 = vpop.f32.mrb[9].mxu0 }
  0xfa   : > { %v704_v12 = vld [vmem:[#allocation2 + $0x8] sm:$0xff] }
  0xfb   : > { %v706_v13 = vadd.f32 %v1500_v58, %v704_v12  ;;  %v703_v14 = vld [vmem:[#allocation2] sm:$0xff] }
  0xfc   : > { %v705_v15 = vadd.f32 %v703_v14, %v694_v59 }
  0xfd   : > { %708 = vst.msk [vmem:[#allocation2 + $0x8] sm:$0xff] %vm437_vm1, %v706_v13 }
  0xfe   : > { %707 = vst.msk [vmem:[#allocation2] sm:$0xff] %vm437_vm1, %v705_v15 }
 0x104   : > { %v796_v16 = vld [vmem:[#allocation2 + $0x8] sm:$0xff] }
 0x105   : > { %v798_v17 = vadd.f32 %v1505_v60, %v796_v16  ;;  %v795_v18 = vld [vmem:[#allocation2] sm:$0xff] }
 0x106   : > { %v797_v19 = vadd.f32 %v795_v18, %v786_v61 }
 0x107   : > { %800 = vst.msk [vmem:[#allocation2 + $0x8] sm:$0xff] %vm437_vm1, %v798_v17 }
 0x108   : > { %799 = vst.msk [vmem:[#allocation2] sm:$0xff] %vm437_vm1, %v797_v19 }
 0x10e   : > { %v888_v20 = vld [vmem:[#allocation2 + $0x8] sm:$0xff] }
 0x10f   : > { %v890_v21 = vadd.f32 %v1510_v63, %v888_v20  ;;  %v887_v22 = vld [vmem:[#allocation2] sm:$0xff] }
 0x110   : > { %v889_v23 = vadd.f32 %v887_v22, %v878_v2 }
 0x111   : > { %892 = vst.msk [vmem:[#allocation2 + $0x8] sm:$0xff] %vm437_vm1, %v890_v21 }
 0x112   : > { %891 = vst.msk [vmem:[#allocation2] sm:$0xff] %vm437_vm1, %v889_v23 }
 0x118   : > { %v980_v24 = vld [vmem:[#allocation2 + $0x8] sm:$0xff] }
 0x119   : > { %v982_v25 = vadd.f32 %v1515_v3, %v980_v24  ;;  %v979_v26 = vld [vmem:[#allocation2] sm:$0xff] }
 0x11a   : > { %v981_v27 = vadd.f32 %v979_v26, %v970_v5 }
 0x11b   : > { %984 = vst.msk [vmem:[#allocation2 + $0x8] sm:$0xff] %vm437_vm1, %v982_v25 }
 0x11c   : > { %983 = vst.msk [vmem:[#allocation2] sm:$0xff] %vm437_vm1, %v981_v27 }
 0x122   : > { %v1076_v28 = vld [vmem:[#allocation2 + $0x8] sm:$0xff] }
 0x123   : > { %v1078_v29 = vadd.f32 %v1520_v6, %v1076_v28  ;;  %v1075_v30 = vld [vmem:[#allocation2] sm:$0xff] }
 0x124   : > { %v1077_v31 = vadd.f32 %v1075_v30, %v1066_v7 }
 0x125   : > { %1080 = vst.msk [vmem:[#allocation2 + $0x8] sm:$0xff] %vm437_vm1, %v1078_v29 }
 0x126   : > { %1079 = vst.msk [vmem:[#allocation2] sm:$0xff] %vm437_vm1, %v1077_v31 }
 0x12c   : > { %v1172_v32 = vld [vmem:[#allocation2 + $0x8] sm:$0xff] }
 0x12d   : > { %v1174_v33 = vadd.f32 %v1525_v8, %v1172_v32  ;;  %v1171_v34 = vld [vmem:[#allocation2] sm:$0xff] }
 0x12e   : > { %v1173_v35 = vadd.f32 %v1171_v34, %v1162_v9 }
 0x12f   : > { %1176 = vst.msk [vmem:[#allocation2 + $0x8] sm:$0xff] %vm437_vm1, %v1174_v33 }
 0x130   : > { %1175 = vst.msk [vmem:[#allocation2] sm:$0xff] %vm437_vm1, %v1173_v35 }
 0x136   : > { %v1268_v36 = vld [vmem:[#allocation2 + $0x8] sm:$0xff] }
 0x137   : > { %v1270_v37 = vadd.f32 %v1530_v10, %v1268_v36  ;;  %v1267_v38 = vld [vmem:[#allocation2] sm:$0xff] }
 0x138   : > { %v1269_v39 = vadd.f32 %v1267_v38, %v1258_v11 }
 0x139   : > { %1272 = vst.msk [vmem:[#allocation2 + $0x8] sm:$0xff] %vm437_vm1, %v1270_v37 }
 0x13a   : > { %1271 = vst.msk [vmem:[#allocation2] sm:$0xff] %vm437_vm1, %v1269_v39 }
 0x140   : > { %v1274_v41 = vld [vmem:[#allocation2 + $0x8] sm:$0xff] }
 0x141   : > { %v1283_v42 = vadd.f32 %v1452_v40, %v1274_v41  ;;  %v1273_v43 = vld [vmem:[#allocation2] sm:$0xff] }
 0x142   : > { %v1282_v44 = vadd.f32 %v1452_v40, %v1273_v43 }
 0x143   : > { %1285 = vst.msk [vmem:[%s405_s30 + $0x8] sm:$0xff] %vm437_vm1, %v1283_v42 }
 0x144   : > { %1284 = vst.msk [vmem:[%s405_s30] sm:$0xff] %vm437_vm1, %v1282_v44 }
 0x145 PF: > { %s18_s27 = sadd.s32 1, %s1546_s27  }
 0x146   : > { %p15_p4 = scmp.ge.s32.totalorder %s18_s27, 4  }
 0x148   :  { %17 = sbr.rel (!%p15_p4) target bundleno = 1 (0x1), region = 105 }

</bundles_post_ra>
